<compile_context>
chip_gen: v7x
topology: tpu7x:2x2x1
jax: 0.10.0
libtpu: 0.0.40
codegen_flags: <defaults>
</compile_context>

<pallas_src>
import functools
import math

import jax
import jax.numpy as jnp
from jax.experimental import pallas as pl
from jax.experimental.pallas import tpu as pltpu

EPS = 1e-6  # reference implementation's LayerNormalization eps


def _layer_norm(x, gamma, beta):
    """LayerNorm over the last dim (d_model), f32 statistics."""
    mean = jnp.mean(x, axis=-1, keepdims=True)
    var = jnp.mean((x - mean) ** 2, axis=-1, keepdims=True)
    return gamma * (x - mean) * jax.lax.rsqrt(var + EPS) + beta


def _attention(q_bf, k_bf, v_bf, bias, wo_ref, bo_ref, heads_ref, *, num_heads):
    """Multi-head attention core with a fused output projection.

    q_bf : (T, D) bf16  (1/sqrt(d_k) already folded in)
    k_bf : (S, D) bf16
    v_bf : (S, D) bf16
    bias : (T, S) or (1, S) f32 additive mask bias (0 keep / -1e9 masked)
    wo_ref : (D, D) bf16 ref ; bo_ref : (1, D) f32 ref
    heads_ref : (T, D) bf16 VMEM scratch collecting per-head outputs
    returns (T, D) f32
    """
    f32 = jnp.float32
    bf16 = jnp.bfloat16
    d_model = q_bf.shape[-1]
    d_k = d_model // num_heads
    nt = (((1,), (1,)), ((), ()))          # contract last dims: Q @ K^T

    # One head at a time: only a single (T, S) f32 score matrix is live.
    for h in range(num_heads):
        lo, hi = h * d_k, (h + 1) * d_k
        s = jax.lax.dot_general(q_bf[:, lo:hi], k_bf[:, lo:hi], nt,
                                preferred_element_type=f32)
        s = s + bias                        # bias broadcasts over query rows if (1, S)
        m = jnp.max(s, axis=-1, keepdims=True)
        p = jnp.exp(s - m)
        l = jnp.sum(p, axis=-1, keepdims=True)
        p = (p / l).astype(bf16)            # exact divide (cheap: (T, S) VALU)
        heads_ref[:, lo:hi] = jnp.dot(p, v_bf[:, lo:hi],
                                      preferred_element_type=f32).astype(bf16)

    # Single full-K output projection: concat(heads) @ Wo on the MXU.
    out = jnp.dot(heads_ref[...], wo_ref[...], preferred_element_type=f32)
    return out + bo_ref[...]


# ---------------------------------------------------------------------------
# Fused decoder-block kernel (one grid step = one batch element)
# ---------------------------------------------------------------------------
def _decoder_block_kernel(
        x_ref, enc_ref, tgt_mask_ref, src_mask_ref,
        # self-attention params
        sa_wqkv, sa_bqkv, sa_wo, sa_bo, sa_g, sa_b,
        # cross-attention params
        ca_wq, ca_bq, ca_wkv, ca_bkv, ca_wo, ca_bo, ca_g, ca_b,
        # feed-forward params
        ff_w1, ff_b1, ff_w2, ff_b2, ff_g, ff_b,
        out_ref,
        heads_ref,                      # (T, D) bf16 VMEM scratch
        *, num_heads, dff_tile):
    f32 = jnp.float32
    bf16 = jnp.bfloat16

    x = x_ref[0].astype(f32)            # (T, D) residual stream, f32
    enc = enc_ref[0]                    # (S, D) bf16 (cast host-side)

    d_model = x.shape[-1]
    d_k = d_model // num_heads
    scale = 1.0 / math.sqrt(d_k)

    # Additive mask biases built once per block (0 = keep, -1e9 = masked).
    tgt_bias = (tgt_mask_ref[0].astype(f32) - 1.0) * 1e9    # (T, T)
    src_bias = (src_mask_ref[0].astype(f32) - 1.0) * 1e9    # (1, S)

    # --- 1) self-attention residual block (fused QKV projection) ------------
    xn = _layer_norm(x, sa_g[...], sa_b[...]).astype(bf16)
    qkv = jnp.dot(xn, sa_wqkv[...], preferred_element_type=f32) + sa_bqkv[...]
    q = (qkv[:, :d_model] * scale).astype(bf16)
    k = qkv[:, d_model:2 * d_model].astype(bf16)
    v = qkv[:, 2 * d_model:].astype(bf16)
    x = x + _attention(q, k, v, tgt_bias, sa_wo, sa_bo, heads_ref,
                       num_heads=num_heads)

    # --- 2) cross-attention residual block (Q from LN(x); K,V from encoder) -
    xn = _layer_norm(x, ca_g[...], ca_b[...]).astype(bf16)
    q = ((jnp.dot(xn, ca_wq[...], preferred_element_type=f32) + ca_bq[...])
         * scale).astype(bf16)
    kv = jnp.dot(enc, ca_wkv[...], preferred_element_type=f32) + ca_bkv[...]
    k = kv[:, :d_model].astype(bf16)
    v = kv[:, d_model:].astype(bf16)
    x = x + _attention(q, k, v, src_bias, ca_wo, ca_bo, heads_ref,
                       num_heads=num_heads)

    # --- 3) feed-forward residual block, hidden dim processed in chunks -----
    xn = _layer_norm(x, ff_g[...], ff_b[...]).astype(bf16)
    d_ff = ff_w1.shape[1]
    ff_out = jnp.zeros_like(x)
    for c0 in range(0, d_ff, dff_tile):
        c1 = min(c0 + dff_tile, d_ff)
        h = jnp.dot(xn, ff_w1[:, c0:c1], preferred_element_type=f32) + ff_b1[:, c0:c1]
        h = jnp.maximum(h, 0.0).astype(bf16)
        ff_out = ff_out + jnp.dot(h, ff_w2[c0:c1, :], preferred_element_type=f32)
    x = x + ff_out + ff_b2[...]

    out_ref[0] = x.astype(out_ref.dtype)


# ---------------------------------------------------------------------------
# Host-side wrapper
# ---------------------------------------------------------------------------
def decoder_block(x, encoder_output, src_mask, tgt_mask, params, *,
                  num_heads, dff_tile=None, vmem_limit_bytes=None):
    """Pallas equivalent of DecoderBlock.forward (eval mode, dropout = identity).

    x:              (B, T, D)   target embeddings
    encoder_output: (B, S, D)
    src_mask:       (B, 1, 1, S)
    tgt_mask:       (B, 1, T, T)
    """
    B, T, D = x.shape
    S = encoder_output.shape[1]
    bf16 = jnp.bfloat16
    f32 = jnp.float32

    sa = params["self_attn"]
    ca = params["cross_attn"]
    ff = params["ffn"]
    Dff = ff["w1"].shape[1]
    if dff_tile is None:
        dff_tile = min(Dff, 512)

    # --- host-side weight packing: fused projections, bf16 MXU operands -----
    sa_wqkv = jnp.concatenate([sa["wq"], sa["wk"], sa["wv"]], axis=1).astype(bf16)
    sa_bqkv = jnp.concatenate([sa["bq"], sa["bk"], sa["bv"]], axis=1).astype(f32)
    ca_wkv = jnp.concatenate([ca["wk"], ca["wv"]], axis=1).astype(bf16)
    ca_bkv = jnp.concatenate([ca["bk"], ca["bv"]], axis=1).astype(f32)

    # --- cut DMA bytes: bf16 encoder activations and compact bf16 masks -----
    enc_bf = encoder_output.astype(bf16)
    tgt_m = tgt_mask[:, 0].astype(bf16)      # (B, T, T)
    src_m = src_mask[:, 0].astype(bf16)      # (B, 1, S)

    def full(shape):
        nd = len(shape)
        return pl.BlockSpec(shape, lambda b, _nd=nd: (0,) * _nd)

    kernel = functools.partial(_decoder_block_kernel,
                               num_heads=num_heads, dff_tile=dff_tile)

    return pl.pallas_call(
        kernel,
        out_shape=jax.ShapeDtypeStruct((B, T, D), x.dtype),
        grid=(B,),
        in_specs=[
            pl.BlockSpec((1, T, D), lambda b: (b, 0, 0)),   # x
            pl.BlockSpec((1, S, D), lambda b: (b, 0, 0)),   # encoder_output (bf16)
            pl.BlockSpec((1, T, T), lambda b: (b, 0, 0)),   # tgt mask (bf16)
            pl.BlockSpec((1, 1, S), lambda b: (b, 0, 0)),   # src mask (bf16)
            # self-attention
            full((D, 3 * D)), full((1, 3 * D)),             # fused Wqkv, bqkv
            full((D, D)), full((1, D)),                     # Wo, bo
            full((1, D)), full((1, D)),                     # gamma, beta
            # cross-attention
            full((D, D)), full((1, D)),                     # Wq, bq
            full((D, 2 * D)), full((1, 2 * D)),             # fused Wkv, bkv
            full((D, D)), full((1, D)),                     # Wo, bo
            full((1, D)), full((1, D)),                     # gamma, beta
            # feed-forward
            full((D, Dff)), full((1, Dff)),                 # W1, b1
            full((Dff, D)), full((1, D)),                   # W2, b2
            full((1, D)), full((1, D)),                     # gamma, beta
        ],
        out_specs=pl.BlockSpec((1, T, D), lambda b: (b, 0, 0)),
        scratch_shapes=[pltpu.VMEM((T, D), bf16)],          # per-head output slab
        input_output_aliases={0: 0},                        # residual updated in place
        compiler_params=pltpu.CompilerParams(
            dimension_semantics=("parallel",),
            vmem_limit_bytes=vmem_limit_bytes),
    )(x, enc_bf, tgt_m, src_m,
      sa_wqkv, sa_bqkv, sa["wo"].astype(bf16), sa["bo"].astype(f32),
      sa["gamma"].astype(f32), sa["beta"].astype(f32),
      ca["wq"].astype(bf16), ca["bq"].astype(f32), ca_wkv, ca_bkv,
      ca["wo"].astype(bf16), ca["bo"].astype(f32),
      ca["gamma"].astype(f32), ca["beta"].astype(f32),
      ff["w1"].astype(bf16), ff["b1"].astype(f32),
      ff["w2"].astype(bf16), ff["b2"].astype(f32),
      ff["gamma"].astype(f32), ff["beta"].astype(f32))


# ---------------------------------------------------------------------------
# Deterministic parameter init + demo
# ---------------------------------------------------------------------------
def init_params(key, d_model, d_ff):
    keys = jax.random.split(key, 12)
    scale = 0.05

    def lin(k, din, dout):
        return scale * jax.random.normal(k, (din, dout), jnp.float32)

    def attn_params(ks):
        return {
            "wq": lin(ks[0], d_model, d_model), "bq": jnp.zeros((1, d_model), jnp.float32),
            "wk": lin(ks[1], d_model, d_model), "bk": jnp.zeros((1, d_model), jnp.float32),
            "wv": lin(ks[2], d_model, d_model), "bv": jnp.zeros((1, d_model), jnp.float32),
            "wo": lin(ks[3], d_model, d_model), "bo": jnp.zeros((1, d_model), jnp.float32),
            "gamma": jnp.ones((1, d_model), jnp.float32),
            "beta": jnp.zeros((1, d_model), jnp.float32),
        }

    return {
        "self_attn": attn_params(keys[0:4]),
        "cross_attn": attn_params(keys[4:8]),
        "ffn": {
            "w1": lin(keys[8], d_model, d_ff), "b1": jnp.zeros((1, d_ff), jnp.float32),
            "w2": lin(keys[9], d_ff, d_model), "b2": jnp.zeros((1, d_model), jnp.float32),
            "gamma": jnp.ones((1, d_model), jnp.float32),
            "beta": jnp.zeros((1, d_model), jnp.float32),
        },
    }


if __name__ == "__main__":
    B, T, S, D, H, DFF = 2, 8, 8, 32, 4, 64

    key = jax.random.PRNGKey(0)
    k_x, k_enc, k_p = jax.random.split(key, 3)

    x = jax.random.normal(k_x, (B, T, D), jnp.float32)
    encoder_output = jax.random.normal(k_enc, (B, S, D), jnp.float32)
    src_mask = jnp.ones((B, 1, 1, S), jnp.float32)
    tgt_mask = jnp.tril(jnp.ones((T, T), jnp.float32))[None, None, :, :]
    tgt_mask = jnp.broadcast_to(tgt_mask, (B, 1, T, T))

    params = init_params(k_p, D, DFF)

    decoder_fn = jax.jit(functools.partial(decoder_block, num_heads=H))
    out = decoder_fn(x, encoder_output, src_mask, tgt_mask, params)
    out = jax.block_until_ready(out)

    assert out.shape == (B, T, D)
    assert bool(jnp.all(jnp.isfinite(out)))
    print("KERNEL_OK")
</pallas_src>

<mosaic_0001>
module attributes {stable_mosaic.version = 11 : i64} {
  func.func @_decoder_block_kernel(%arg0: i32, %arg1: memref<1x8x32xf32, #tpu.memory_space<vmem>>, %arg2: memref<1x8x32xbf16, #tpu.memory_space<vmem>>, %arg3: memref<1x8x8xbf16, #tpu.memory_space<vmem>>, %arg4: memref<1x1x8xbf16, #tpu.memory_space<vmem>>, %arg5: memref<32x96xbf16, #tpu.memory_space<vmem>>, %arg6: memref<1x96xf32, #tpu.memory_space<vmem>>, %arg7: memref<32x32xbf16, #tpu.memory_space<vmem>>, %arg8: memref<1x32xf32, #tpu.memory_space<vmem>>, %arg9: memref<1x32xf32, #tpu.memory_space<vmem>>, %arg10: memref<1x32xf32, #tpu.memory_space<vmem>>, %arg11: memref<32x32xbf16, #tpu.memory_space<vmem>>, %arg12: memref<1x32xf32, #tpu.memory_space<vmem>>, %arg13: memref<32x64xbf16, #tpu.memory_space<vmem>>, %arg14: memref<1x64xf32, #tpu.memory_space<vmem>>, %arg15: memref<32x32xbf16, #tpu.memory_space<vmem>>, %arg16: memref<1x32xf32, #tpu.memory_space<vmem>>, %arg17: memref<1x32xf32, #tpu.memory_space<vmem>>, %arg18: memref<1x32xf32, #tpu.memory_space<vmem>>, %arg19: memref<32x64xbf16, #tpu.memory_space<vmem>>, %arg20: memref<1x64xf32, #tpu.memory_space<vmem>>, %arg21: memref<64x32xbf16, #tpu.memory_space<vmem>>, %arg22: memref<1x32xf32, #tpu.memory_space<vmem>>, %arg23: memref<1x32xf32, #tpu.memory_space<vmem>>, %arg24: memref<1x32xf32, #tpu.memory_space<vmem>>, %arg25: memref<1x8x32xf32, #tpu.memory_space<vmem>>, %arg26: memref<8x32xbf16, #tpu.memory_space<vmem>>) attributes {dimension_semantics = [#tpu.dimension_semantics<parallel>], iteration_bounds = array<i64: 2>, scalar_prefetch = 0 : i64, scratch_operands = 1 : i64, tpu.core_type = #tpu.core_type<tc>, window_params = [{transform_indices = @transform_0, window_bounds = array<i64: 1, 8, 32>}, {transform_indices = @transform_1, window_bounds = array<i64: 1, 8, 32>}, {transform_indices = @transform_2, window_bounds = array<i64: 1, 8, 8>}, {transform_indices = @transform_3, window_bounds = array<i64: 1, 1, 8>}, {pipeline_mode = #tpu.pipeline_mode<synchronous>, transform_indices = @transform_4, window_bounds = array<i64: 32, 96>}, {pipeline_mode = #tpu.pipeline_mode<synchronous>, transform_indices = @transform_5, window_bounds = array<i64: 1, 96>}, {pipeline_mode = #tpu.pipeline_mode<synchronous>, transform_indices = @transform_6, window_bounds = array<i64: 32, 32>}, {pipeline_mode = #tpu.pipeline_mode<synchronous>, transform_indices = @transform_7, window_bounds = array<i64: 1, 32>}, {pipeline_mode = #tpu.pipeline_mode<synchronous>, transform_indices = @transform_8, window_bounds = array<i64: 1, 32>}, {pipeline_mode = #tpu.pipeline_mode<synchronous>, transform_indices = @transform_9, window_bounds = array<i64: 1, 32>}, {pipeline_mode = #tpu.pipeline_mode<synchronous>, transform_indices = @transform_10, window_bounds = array<i64: 32, 32>}, {pipeline_mode = #tpu.pipeline_mode<synchronous>, transform_indices = @transform_11, window_bounds = array<i64: 1, 32>}, {pipeline_mode = #tpu.pipeline_mode<synchronous>, transform_indices = @transform_12, window_bounds = array<i64: 32, 64>}, {pipeline_mode = #tpu.pipeline_mode<synchronous>, transform_indices = @transform_13, window_bounds = array<i64: 1, 64>}, {pipeline_mode = #tpu.pipeline_mode<synchronous>, transform_indices = @transform_14, window_bounds = array<i64: 32, 32>}, {pipeline_mode = #tpu.pipeline_mode<synchronous>, transform_indices = @transform_15, window_bounds = array<i64: 1, 32>}, {pipeline_mode = #tpu.pipeline_mode<synchronous>, transform_indices = @transform_16, window_bounds = array<i64: 1, 32>}, {pipeline_mode = #tpu.pipeline_mode<synchronous>, transform_indices = @transform_17, window_bounds = array<i64: 1, 32>}, {pipeline_mode = #tpu.pipeline_mode<synchronous>, transform_indices = @transform_18, window_bounds = array<i64: 32, 64>}, {pipeline_mode = #tpu.pipeline_mode<synchronous>, transform_indices = @transform_19, window_bounds = array<i64: 1, 64>}, {pipeline_mode = #tpu.pipeline_mode<synchronous>, transform_indices = @transform_20, window_bounds = array<i64: 64, 32>}, {pipeline_mode = #tpu.pipeline_mode<synchronous>, transform_indices = @transform_21, window_bounds = array<i64: 1, 32>}, {pipeline_mode = #tpu.pipeline_mode<synchronous>, transform_indices = @transform_22, window_bounds = array<i64: 1, 32>}, {pipeline_mode = #tpu.pipeline_mode<synchronous>, transform_indices = @transform_23, window_bounds = array<i64: 1, 32>}, {transform_indices = @transform_24, window_bounds = array<i64: 1, 8, 32>}]} {
    %c0 = arith.constant 0 : index
    %c0_0 = arith.constant 0 : index
    %c0_1 = arith.constant 0 : index
    %0 = vector.load %arg1[%c0, %c0_0, %c0_1] : memref<1x8x32xf32, #tpu.memory_space<vmem>>, vector<1x8x32xf32>
    %1 = vector.shape_cast %0 : vector<1x8x32xf32> to vector<8x32xf32>
    %c0_2 = arith.constant 0 : index
    %c0_3 = arith.constant 0 : index
    %c0_4 = arith.constant 0 : index
    %2 = vector.load %arg2[%c0_2, %c0_3, %c0_4] : memref<1x8x32xbf16, #tpu.memory_space<vmem>>, vector<1x8x32xbf16>
    %3 = vector.shape_cast %2 : vector<1x8x32xbf16> to vector<8x32xbf16>
    %c0_5 = arith.constant 0 : index
    %c0_6 = arith.constant 0 : index
    %c0_7 = arith.constant 0 : index
    %4 = vector.load %arg3[%c0_5, %c0_6, %c0_7] : memref<1x8x8xbf16, #tpu.memory_space<vmem>>, vector<1x8x8xbf16>
    %5 = vector.shape_cast %4 : vector<1x8x8xbf16> to vector<8x8xbf16>
    %6 = arith.extf %5 : vector<8x8xbf16> to vector<8x8xf32>
    %cst = arith.constant 1.000000e+00 : f32
    %7 = vector.broadcast %cst : f32 to vector<8x8xf32>
    %8 = arith.subf %6, %7 : vector<8x8xf32>
    %cst_8 = arith.constant 1.000000e+09 : f32
    %9 = vector.broadcast %cst_8 : f32 to vector<8x8xf32>
    %10 = arith.mulf %8, %9 : vector<8x8xf32>
    %c0_9 = arith.constant 0 : index
    %c0_10 = arith.constant 0 : index
    %c0_11 = arith.constant 0 : index
    %11 = vector.load %arg4[%c0_9, %c0_10, %c0_11] : memref<1x1x8xbf16, #tpu.memory_space<vmem>>, vector<1x1x8xbf16>
    %12 = vector.shape_cast %11 : vector<1x1x8xbf16> to vector<1x8xbf16>
    %13 = arith.extf %12 : vector<1x8xbf16> to vector<1x8xf32>
    %cst_12 = arith.constant 1.000000e+00 : f32
    %14 = vector.broadcast %cst_12 : f32 to vector<1x8xf32>
    %15 = arith.subf %13, %14 : vector<1x8xf32>
    %cst_13 = arith.constant 1.000000e+09 : f32
    %16 = vector.broadcast %cst_13 : f32 to vector<1x8xf32>
    %17 = arith.mulf %15, %16 : vector<1x8xf32>
    %c0_14 = arith.constant 0 : index
    %c0_15 = arith.constant 0 : index
    %18 = vector.load %arg9[%c0_14, %c0_15] : memref<1x32xf32, #tpu.memory_space<vmem>>, vector<1x32xf32>
    %c0_16 = arith.constant 0 : index
    %c0_17 = arith.constant 0 : index
    %19 = vector.load %arg10[%c0_16, %c0_17] : memref<1x32xf32, #tpu.memory_space<vmem>>, vector<1x32xf32>
    %cst_18 = arith.constant dense<0.000000e+00> : vector<8xf32>
    %20 = vector.multi_reduction <add>, %1, %cst_18 [1] : vector<8x32xf32> to vector<8xf32>
    %21 = vector.shape_cast %20 : vector<8xf32> to vector<8x1xf32>
    %cst_19 = arith.constant 3.200000e+01 : f32
    %22 = vector.broadcast %cst_19 : f32 to vector<8x1xf32>
    %23 = arith.divf %21, %22 : vector<8x1xf32>
    %24 = vector.broadcast %23 : vector<8x1xf32> to vector<8x32xf32>
    %25 = arith.subf %1, %24 : vector<8x32xf32>
    %26 = arith.mulf %25, %25 : vector<8x32xf32>
    %cst_20 = arith.constant dense<0.000000e+00> : vector<8xf32>
    %27 = vector.multi_reduction <add>, %26, %cst_20 [1] : vector<8x32xf32> to vector<8xf32>
    %28 = vector.shape_cast %27 : vector<8xf32> to vector<8x1xf32>
    %cst_21 = arith.constant 3.200000e+01 : f32
    %29 = vector.broadcast %cst_21 : f32 to vector<8x1xf32>
    %30 = arith.divf %28, %29 : vector<8x1xf32>
    %31 = vector.broadcast %23 : vector<8x1xf32> to vector<8x32xf32>
    %32 = arith.subf %1, %31 : vector<8x32xf32>
    %33 = vector.broadcast %18 : vector<1x32xf32> to vector<8x32xf32>
    %34 = arith.mulf %33, %32 : vector<8x32xf32>
    %cst_22 = arith.constant 9.99999997E-7 : f32
    %35 = vector.broadcast %cst_22 : f32 to vector<8x1xf32>
    %36 = arith.addf %30, %35 : vector<8x1xf32>
    %37 = math.rsqrt %36 : vector<8x1xf32>
    %38 = vector.broadcast %37 : vector<8x1xf32> to vector<8x32xf32>
    %39 = arith.mulf %34, %38 : vector<8x32xf32>
    %40 = vector.broadcast %19 : vector<1x32xf32> to vector<8x32xf32>
    %41 = arith.addf %39, %40 : vector<8x32xf32>
    %42 = arith.truncf %41 : vector<8x32xf32> to vector<8x32xbf16>
    %c0_23 = arith.constant 0 : index
    %c0_24 = arith.constant 0 : index
    %43 = vector.load %arg5[%c0_23, %c0_24] : memref<32x96xbf16, #tpu.memory_space<vmem>>, vector<32x96xbf16>
    %cst_25 = arith.constant dense<0.000000e+00> : vector<8x96xf32>
    %44 = tpu.matmul %42, %43, %cst_25 {dimension_numbers = #tpu.dot_dimension_numbers<[1], [0], [0], [1], [0, 0, 1, 1], [], []>} : vector<8x32xbf16>, vector<32x96xbf16>, vector<8x96xf32> -> vector<8x96xf32>
    %c0_26 = arith.constant 0 : index
    %c0_27 = arith.constant 0 : index
    %45 = vector.load %arg6[%c0_26, %c0_27] : memref<1x96xf32, #tpu.memory_space<vmem>>, vector<1x96xf32>
    %46 = vector.broadcast %45 : vector<1x96xf32> to vector<8x96xf32>
    %47 = arith.addf %44, %46 : vector<8x96xf32>
    %48 = vector.extract_strided_slice %47 {offsets = [0, 0], sizes = [8, 32], strides = [1, 1]} : vector<8x96xf32> to vector<8x32xf32>
    %cst_28 = arith.constant 0.353553385 : f32
    %49 = vector.broadcast %cst_28 : f32 to vector<8x32xf32>
    %50 = arith.mulf %48, %49 : vector<8x32xf32>
    %51 = arith.truncf %50 : vector<8x32xf32> to vector<8x32xbf16>
    %52 = vector.extract_strided_slice %47 {offsets = [0, 32], sizes = [8, 32], strides = [1, 1]} : vector<8x96xf32> to vector<8x32xf32>
    %53 = arith.truncf %52 : vector<8x32xf32> to vector<8x32xbf16>
    %54 = vector.extract_strided_slice %47 {offsets = [0, 64], sizes = [8, 32], strides = [1, 1]} : vector<8x96xf32> to vector<8x32xf32>
    %55 = arith.truncf %54 : vector<8x32xf32> to vector<8x32xbf16>
    %56 = vector.extract_strided_slice %51 {offsets = [0, 0], sizes = [8, 8], strides = [1, 1]} : vector<8x32xbf16> to vector<8x8xbf16>
    %57 = vector.extract_strided_slice %53 {offsets = [0, 0], sizes = [8, 8], strides = [1, 1]} : vector<8x32xbf16> to vector<8x8xbf16>
    %cst_29 = arith.constant dense<0.000000e+00> : vector<8x8xf32>
    %58 = tpu.matmul %56, %57, %cst_29 {dimension_numbers = #tpu.dot_dimension_numbers<[1], [1], [0], [0], [0, 0, 1, 0], [], []>} : vector<8x8xbf16>, vector<8x8xbf16>, vector<8x8xf32> -> vector<8x8xf32>
    %59 = arith.addf %58, %10 : vector<8x8xf32>
    %cst_30 = arith.constant dense<0xFF800000> : vector<8xf32>
    %60 = vector.multi_reduction <maximumf>, %59, %cst_30 [1] : vector<8x8xf32> to vector<8xf32>
    %61 = vector.shape_cast %60 : vector<8xf32> to vector<8x1xf32>
    %62 = vector.broadcast %61 : vector<8x1xf32> to vector<8x8xf32>
    %63 = arith.subf %59, %62 : vector<8x8xf32>
    %64 = math.exp %63 : vector<8x8xf32>
    %cst_31 = arith.constant dense<0.000000e+00> : vector<8xf32>
    %65 = vector.multi_reduction <add>, %64, %cst_31 [1] : vector<8x8xf32> to vector<8xf32>
    %66 = vector.shape_cast %65 : vector<8xf32> to vector<8x1xf32>
    %67 = vector.broadcast %66 : vector<8x1xf32> to vector<8x8xf32>
    %68 = arith.divf %64, %67 : vector<8x8xf32>
    %69 = arith.truncf %68 : vector<8x8xf32> to vector<8x8xbf16>
    %70 = vector.extract_strided_slice %55 {offsets = [0, 0], sizes = [8, 8], strides = [1, 1]} : vector<8x32xbf16> to vector<8x8xbf16>
    %cst_32 = arith.constant dense<0.000000e+00> : vector<8x8xf32>
    %71 = tpu.matmul %69, %70, %cst_32 {dimension_numbers = #tpu.dot_dimension_numbers<[1], [0], [0], [1], [0, 0, 1, 1], [], []>} : vector<8x8xbf16>, vector<8x8xbf16>, vector<8x8xf32> -> vector<8x8xf32>
    %72 = arith.truncf %71 : vector<8x8xf32> to vector<8x8xbf16>
    %c0_33 = arith.constant 0 : index
    %c0_34 = arith.constant 0 : index
    %73 = vector.load %arg26[%c0_33, %c0_34] : memref<8x32xbf16, #tpu.memory_space<vmem>>, vector<8x8xbf16>
    tpu.vector_store %arg26[%c0_33, %c0_34], %72 {strides = array<i32>} : memref<8x32xbf16, #tpu.memory_space<vmem>>, vector<8x8xbf16>,
    %74 = vector.extract_strided_slice %51 {offsets = [0, 8], sizes = [8, 8], strides = [1, 1]} : vector<8x32xbf16> to vector<8x8xbf16>
    %75 = vector.extract_strided_slice %53 {offsets = [0, 8], sizes = [8, 8], strides = [1, 1]} : vector<8x32xbf16> to vector<8x8xbf16>
    %cst_35 = arith.constant dense<0.000000e+00> : vector<8x8xf32>
    %76 = tpu.matmul %74, %75, %cst_35 {dimension_numbers = #tpu.dot_dimension_numbers<[1], [1], [0], [0], [0, 0, 1, 0], [], []>} : vector<8x8xbf16>, vector<8x8xbf16>, vector<8x8xf32> -> vector<8x8xf32>
    %77 = arith.addf %76, %10 : vector<8x8xf32>
    %cst_36 = arith.constant dense<0xFF800000> : vector<8xf32>
    %78 = vector.multi_reduction <maximumf>, %77, %cst_36 [1] : vector<8x8xf32> to vector<8xf32>
    %79 = vector.shape_cast %78 : vector<8xf32> to vector<8x1xf32>
    %80 = vector.broadcast %79 : vector<8x1xf32> to vector<8x8xf32>
    %81 = arith.subf %77, %80 : vector<8x8xf32>
    %82 = math.exp %81 : vector<8x8xf32>
    %cst_37 = arith.constant dense<0.000000e+00> : vector<8xf32>
    %83 = vector.multi_reduction <add>, %82, %cst_37 [1] : vector<8x8xf32> to vector<8xf32>
    %84 = vector.shape_cast %83 : vector<8xf32> to vector<8x1xf32>
    %85 = vector.broadcast %84 : vector<8x1xf32> to vector<8x8xf32>
    %86 = arith.divf %82, %85 : vector<8x8xf32>
    %87 = arith.truncf %86 : vector<8x8xf32> to vector<8x8xbf16>
    %88 = vector.extract_strided_slice %55 {offsets = [0, 8], sizes = [8, 8], strides = [1, 1]} : vector<8x32xbf16> to vector<8x8xbf16>
    %cst_38 = arith.constant dense<0.000000e+00> : vector<8x8xf32>
    %89 = tpu.matmul %87, %88, %cst_38 {dimension_numbers = #tpu.dot_dimension_numbers<[1], [0], [0], [1], [0, 0, 1, 1], [], []>} : vector<8x8xbf16>, vector<8x8xbf16>, vector<8x8xf32> -> vector<8x8xf32>
    %90 = arith.truncf %89 : vector<8x8xf32> to vector<8x8xbf16>
    %c0_39 = arith.constant 0 : index
    %c8 = arith.constant 8 : index
    %91 = vector.load %arg26[%c0_39, %c8] : memref<8x32xbf16, #tpu.memory_space<vmem>>, vector<8x8xbf16>
    tpu.vector_store %arg26[%c0_39, %c8], %90 {strides = array<i32>} : memref<8x32xbf16, #tpu.memory_space<vmem>>, vector<8x8xbf16>,
    %92 = vector.extract_strided_slice %51 {offsets = [0, 16], sizes = [8, 8], strides = [1, 1]} : vector<8x32xbf16> to vector<8x8xbf16>
    %93 = vector.extract_strided_slice %53 {offsets = [0, 16], sizes = [8, 8], strides = [1, 1]} : vector<8x32xbf16> to vector<8x8xbf16>
    %cst_40 = arith.constant dense<0.000000e+00> : vector<8x8xf32>
    %94 = tpu.matmul %92, %93, %cst_40 {dimension_numbers = #tpu.dot_dimension_numbers<[1], [1], [0], [0], [0, 0, 1, 0], [], []>} : vector<8x8xbf16>, vector<8x8xbf16>, vector<8x8xf32> -> vector<8x8xf32>
    %95 = arith.addf %94, %10 : vector<8x8xf32>
    %cst_41 = arith.constant dense<0xFF800000> : vector<8xf32>
    %96 = vector.multi_reduction <maximumf>, %95, %cst_41 [1] : vector<8x8xf32> to vector<8xf32>
    %97 = vector.shape_cast %96 : vector<8xf32> to vector<8x1xf32>
    %98 = vector.broadcast %97 : vector<8x1xf32> to vector<8x8xf32>
    %99 = arith.subf %95, %98 : vector<8x8xf32>
    %100 = math.exp %99 : vector<8x8xf32>
    %cst_42 = arith.constant dense<0.000000e+00> : vector<8xf32>
    %101 = vector.multi_reduction <add>, %100, %cst_42 [1] : vector<8x8xf32> to vector<8xf32>
    %102 = vector.shape_cast %101 : vector<8xf32> to vector<8x1xf32>
    %103 = vector.broadcast %102 : vector<8x1xf32> to vector<8x8xf32>
    %104 = arith.divf %100, %103 : vector<8x8xf32>
    %105 = arith.truncf %104 : vector<8x8xf32> to vector<8x8xbf16>
    %106 = vector.extract_strided_slice %55 {offsets = [0, 16], sizes = [8, 8], strides = [1, 1]} : vector<8x32xbf16> to vector<8x8xbf16>
    %cst_43 = arith.constant dense<0.000000e+00> : vector<8x8xf32>
    %107 = tpu.matmul %105, %106, %cst_43 {dimension_numbers = #tpu.dot_dimension_numbers<[1], [0], [0], [1], [0, 0, 1, 1], [], []>} : vector<8x8xbf16>, vector<8x8xbf16>, vector<8x8xf32> -> vector<8x8xf32>
    %108 = arith.truncf %107 : vector<8x8xf32> to vector<8x8xbf16>
    %c0_44 = arith.constant 0 : index
    %c16 = arith.constant 16 : index
    %109 = vector.load %arg26[%c0_44, %c16] : memref<8x32xbf16, #tpu.memory_space<vmem>>, vector<8x8xbf16>
    tpu.vector_store %arg26[%c0_44, %c16], %108 {strides = array<i32>} : memref<8x32xbf16, #tpu.memory_space<vmem>>, vector<8x8xbf16>,
    %110 = vector.extract_strided_slice %51 {offsets = [0, 24], sizes = [8, 8], strides = [1, 1]} : vector<8x32xbf16> to vector<8x8xbf16>
    %111 = vector.extract_strided_slice %53 {offsets = [0, 24], sizes = [8, 8], strides = [1, 1]} : vector<8x32xbf16> to vector<8x8xbf16>
    %cst_45 = arith.constant dense<0.000000e+00> : vector<8x8xf32>
    %112 = tpu.matmul %110, %111, %cst_45 {dimension_numbers = #tpu.dot_dimension_numbers<[1], [1], [0], [0], [0, 0, 1, 0], [], []>} : vector<8x8xbf16>, vector<8x8xbf16>, vector<8x8xf32> -> vector<8x8xf32>
    %113 = arith.addf %112, %10 : vector<8x8xf32>
    %cst_46 = arith.constant dense<0xFF800000> : vector<8xf32>
    %114 = vector.multi_reduction <maximumf>, %113, %cst_46 [1] : vector<8x8xf32> to vector<8xf32>
    %115 = vector.shape_cast %114 : vector<8xf32> to vector<8x1xf32>
    %116 = vector.broadcast %115 : vector<8x1xf32> to vector<8x8xf32>
    %117 = arith.subf %113, %116 : vector<8x8xf32>
    %118 = math.exp %117 : vector<8x8xf32>
    %cst_47 = arith.constant dense<0.000000e+00> : vector<8xf32>
    %119 = vector.multi_reduction <add>, %118, %cst_47 [1] : vector<8x8xf32> to vector<8xf32>
    %120 = vector.shape_cast %119 : vector<8xf32> to vector<8x1xf32>
    %121 = vector.broadcast %120 : vector<8x1xf32> to vector<8x8xf32>
    %122 = arith.divf %118, %121 : vector<8x8xf32>
    %123 = arith.truncf %122 : vector<8x8xf32> to vector<8x8xbf16>
    %124 = vector.extract_strided_slice %55 {offsets = [0, 24], sizes = [8, 8], strides = [1, 1]} : vector<8x32xbf16> to vector<8x8xbf16>
    %cst_48 = arith.constant dense<0.000000e+00> : vector<8x8xf32>
    %125 = tpu.matmul %123, %124, %cst_48 {dimension_numbers = #tpu.dot_dimension_numbers<[1], [0], [0], [1], [0, 0, 1, 1], [], []>} : vector<8x8xbf16>, vector<8x8xbf16>, vector<8x8xf32> -> vector<8x8xf32>
    %126 = arith.truncf %125 : vector<8x8xf32> to vector<8x8xbf16>
    %c0_49 = arith.constant 0 : index
    %c24 = arith.constant 24 : index
    %127 = vector.load %arg26[%c0_49, %c24] : memref<8x32xbf16, #tpu.memory_space<vmem>>, vector<8x8xbf16>
    tpu.vector_store %arg26[%c0_49, %c24], %126 {strides = array<i32>} : memref<8x32xbf16, #tpu.memory_space<vmem>>, vector<8x8xbf16>,
    %c0_50 = arith.constant 0 : index
    %c0_51 = arith.constant 0 : index
    %128 = vector.load %arg26[%c0_50, %c0_51] : memref<8x32xbf16, #tpu.memory_space<vmem>>, vector<8x32xbf16>
    %c0_52 = arith.constant 0 : index
    %c0_53 = arith.constant 0 : index
    %129 = vector.load %arg7[%c0_52, %c0_53] : memref<32x32xbf16, #tpu.memory_space<vmem>>, vector<32x32xbf16>
    %cst_54 = arith.constant dense<0.000000e+00> : vector<8x32xf32>
    %130 = tpu.matmul %128, %129, %cst_54 {dimension_numbers = #tpu.dot_dimension_numbers<[1], [0], [0], [1], [0, 0, 1, 1], [], []>} : vector<8x32xbf16>, vector<32x32xbf16>, vector<8x32xf32> -> vector<8x32xf32>
    %c0_55 = arith.constant 0 : index
    %c0_56 = arith.constant 0 : index
    %131 = vector.load %arg8[%c0_55, %c0_56] : memref<1x32xf32, #tpu.memory_space<vmem>>, vector<1x32xf32>
    %132 = vector.broadcast %131 : vector<1x32xf32> to vector<8x32xf32>
    %133 = arith.addf %130, %132 : vector<8x32xf32>
    %134 = arith.addf %1, %133 : vector<8x32xf32>
    %c0_57 = arith.constant 0 : index
    %c0_58 = arith.constant 0 : index
    %135 = vector.load %arg17[%c0_57, %c0_58] : memref<1x32xf32, #tpu.memory_space<vmem>>, vector<1x32xf32>
    %c0_59 = arith.constant 0 : index
    %c0_60 = arith.constant 0 : index
    %136 = vector.load %arg18[%c0_59, %c0_60] : memref<1x32xf32, #tpu.memory_space<vmem>>, vector<1x32xf32>
    %cst_61 = arith.constant dense<0.000000e+00> : vector<8xf32>
    %137 = vector.multi_reduction <add>, %134, %cst_61 [1] : vector<8x32xf32> to vector<8xf32>
    %138 = vector.shape_cast %137 : vector<8xf32> to vector<8x1xf32>
    %cst_62 = arith.constant 3.200000e+01 : f32
    %139 = vector.broadcast %cst_62 : f32 to vector<8x1xf32>
    %140 = arith.divf %138, %139 : vector<8x1xf32>
    %141 = vector.broadcast %140 : vector<8x1xf32> to vector<8x32xf32>
    %142 = arith.subf %134, %141 : vector<8x32xf32>
    %143 = arith.mulf %142, %142 : vector<8x32xf32>
    %cst_63 = arith.constant dense<0.000000e+00> : vector<8xf32>
    %144 = vector.multi_reduction <add>, %143, %cst_63 [1] : vector<8x32xf32> to vector<8xf32>
    %145 = vector.shape_cast %144 : vector<8xf32> to vector<8x1xf32>
    %cst_64 = arith.constant 3.200000e+01 : f32
    %146 = vector.broadcast %cst_64 : f32 to vector<8x1xf32>
    %147 = arith.divf %145, %146 : vector<8x1xf32>
    %148 = vector.broadcast %140 : vector<8x1xf32> to vector<8x32xf32>
    %149 = arith.subf %134, %148 : vector<8x32xf32>
    %150 = vector.broadcast %135 : vector<1x32xf32> to vector<8x32xf32>
    %151 = arith.mulf %150, %149 : vector<8x32xf32>
    %cst_65 = arith.constant 9.99999997E-7 : f32
    %152 = vector.broadcast %cst_65 : f32 to vector<8x1xf32>
    %153 = arith.addf %147, %152 : vector<8x1xf32>
    %154 = math.rsqrt %153 : vector<8x1xf32>
    %155 = vector.broadcast %154 : vector<8x1xf32> to vector<8x32xf32>
    %156 = arith.mulf %151, %155 : vector<8x32xf32>
    %157 = vector.broadcast %136 : vector<1x32xf32> to vector<8x32xf32>
    %158 = arith.addf %156, %157 : vector<8x32xf32>
    %159 = arith.truncf %158 : vector<8x32xf32> to vector<8x32xbf16>
    %c0_66 = arith.constant 0 : index
    %c0_67 = arith.constant 0 : index
    %160 = vector.load %arg11[%c0_66, %c0_67] : memref<32x32xbf16, #tpu.memory_space<vmem>>, vector<32x32xbf16>
    %cst_68 = arith.constant dense<0.000000e+00> : vector<8x32xf32>
    %161 = tpu.matmul %159, %160, %cst_68 {dimension_numbers = #tpu.dot_dimension_numbers<[1], [0], [0], [1], [0, 0, 1, 1], [], []>} : vector<8x32xbf16>, vector<32x32xbf16>, vector<8x32xf32> -> vector<8x32xf32>
    %c0_69 = arith.constant 0 : index
    %c0_70 = arith.constant 0 : index
    %162 = vector.load %arg12[%c0_69, %c0_70] : memref<1x32xf32, #tpu.memory_space<vmem>>, vector<1x32xf32>
    %163 = vector.broadcast %162 : vector<1x32xf32> to vector<8x32xf32>
    %164 = arith.addf %161, %163 : vector<8x32xf32>
    %cst_71 = arith.constant 0.353553385 : f32
    %165 = vector.broadcast %cst_71 : f32 to vector<8x32xf32>
    %166 = arith.mulf %164, %165 : vector<8x32xf32>
    %167 = arith.truncf %166 : vector<8x32xf32> to vector<8x32xbf16>
    %c0_72 = arith.constant 0 : index
    %c0_73 = arith.constant 0 : index
    %168 = vector.load %arg13[%c0_72, %c0_73] : memref<32x64xbf16, #tpu.memory_space<vmem>>, vector<32x64xbf16>
    %cst_74 = arith.constant dense<0.000000e+00> : vector<8x64xf32>
    %169 = tpu.matmul %3, %168, %cst_74 {dimension_numbers = #tpu.dot_dimension_numbers<[1], [0], [0], [1], [0, 0, 1, 1], [], []>} : vector<8x32xbf16>, vector<32x64xbf16>, vector<8x64xf32> -> vector<8x64xf32>
    %c0_75 = arith.constant 0 : index
    %c0_76 = arith.constant 0 : index
    %170 = vector.load %arg14[%c0_75, %c0_76] : memref<1x64xf32, #tpu.memory_space<vmem>>, vector<1x64xf32>
    %171 = vector.broadcast %170 : vector<1x64xf32> to vector<8x64xf32>
    %172 = arith.addf %169, %171 : vector<8x64xf32>
    %173 = vector.extract_strided_slice %172 {offsets = [0, 0], sizes = [8, 32], strides = [1, 1]} : vector<8x64xf32> to vector<8x32xf32>
    %174 = arith.truncf %173 : vector<8x32xf32> to vector<8x32xbf16>
    %175 = vector.extract_strided_slice %172 {offsets = [0, 32], sizes = [8, 32], strides = [1, 1]} : vector<8x64xf32> to vector<8x32xf32>
    %176 = arith.truncf %175 : vector<8x32xf32> to vector<8x32xbf16>
    %177 = vector.extract_strided_slice %167 {offsets = [0, 0], sizes = [8, 8], strides = [1, 1]} : vector<8x32xbf16> to vector<8x8xbf16>
    %178 = vector.extract_strided_slice %174 {offsets = [0, 0], sizes = [8, 8], strides = [1, 1]} : vector<8x32xbf16> to vector<8x8xbf16>
    %cst_77 = arith.constant dense<0.000000e+00> : vector<8x8xf32>
    %179 = tpu.matmul %177, %178, %cst_77 {dimension_numbers = #tpu.dot_dimension_numbers<[1], [1], [0], [0], [0, 0, 1, 0], [], []>} : vector<8x8xbf16>, vector<8x8xbf16>, vector<8x8xf32> -> vector<8x8xf32>
    %180 = vector.broadcast %17 : vector<1x8xf32> to vector<8x8xf32>
    %181 = arith.addf %179, %180 : vector<8x8xf32>
    %cst_78 = arith.constant dense<0xFF800000> : vector<8xf32>
    %182 = vector.multi_reduction <maximumf>, %181, %cst_78 [1] : vector<8x8xf32> to vector<8xf32>
    %183 = vector.shape_cast %182 : vector<8xf32> to vector<8x1xf32>
    %184 = vector.broadcast %183 : vector<8x1xf32> to vector<8x8xf32>
    %185 = arith.subf %181, %184 : vector<8x8xf32>
    %186 = math.exp %185 : vector<8x8xf32>
    %cst_79 = arith.constant dense<0.000000e+00> : vector<8xf32>
    %187 = vector.multi_reduction <add>, %186, %cst_79 [1] : vector<8x8xf32> to vector<8xf32>
    %188 = vector.shape_cast %187 : vector<8xf32> to vector<8x1xf32>
    %189 = vector.broadcast %188 : vector<8x1xf32> to vector<8x8xf32>
    %190 = arith.divf %186, %189 : vector<8x8xf32>
    %191 = arith.truncf %190 : vector<8x8xf32> to vector<8x8xbf16>
    %192 = vector.extract_strided_slice %176 {offsets = [0, 0], sizes = [8, 8], strides = [1, 1]} : vector<8x32xbf16> to vector<8x8xbf16>
    %cst_80 = arith.constant dense<0.000000e+00> : vector<8x8xf32>
    %193 = tpu.matmul %191, %192, %cst_80 {dimension_numbers = #tpu.dot_dimension_numbers<[1], [0], [0], [1], [0, 0, 1, 1], [], []>} : vector<8x8xbf16>, vector<8x8xbf16>, vector<8x8xf32> -> vector<8x8xf32>
    %194 = arith.truncf %193 : vector<8x8xf32> to vector<8x8xbf16>
    %c0_81 = arith.constant 0 : index
    %c0_82 = arith.constant 0 : index
    %195 = vector.load %arg26[%c0_81, %c0_82] : memref<8x32xbf16, #tpu.memory_space<vmem>>, vector<8x8xbf16>
    tpu.vector_store %arg26[%c0_81, %c0_82], %194 {strides = array<i32>} : memref<8x32xbf16, #tpu.memory_space<vmem>>, vector<8x8xbf16>,
    %196 = vector.extract_strided_slice %167 {offsets = [0, 8], sizes = [8, 8], strides = [1, 1]} : vector<8x32xbf16> to vector<8x8xbf16>
    %197 = vector.extract_strided_slice %174 {offsets = [0, 8], sizes = [8, 8], strides = [1, 1]} : vector<8x32xbf16> to vector<8x8xbf16>
    %cst_83 = arith.constant dense<0.000000e+00> : vector<8x8xf32>
    %198 = tpu.matmul %196, %197, %cst_83 {dimension_numbers = #tpu.dot_dimension_numbers<[1], [1], [0], [0], [0, 0, 1, 0], [], []>} : vector<8x8xbf16>, vector<8x8xbf16>, vector<8x8xf32> -> vector<8x8xf32>
    %199 = vector.broadcast %17 : vector<1x8xf32> to vector<8x8xf32>
    %200 = arith.addf %198, %199 : vector<8x8xf32>
    %cst_84 = arith.constant dense<0xFF800000> : vector<8xf32>
    %201 = vector.multi_reduction <maximumf>, %200, %cst_84 [1] : vector<8x8xf32> to vector<8xf32>
    %202 = vector.shape_cast %201 : vector<8xf32> to vector<8x1xf32>
    %203 = vector.broadcast %202 : vector<8x1xf32> to vector<8x8xf32>
    %204 = arith.subf %200, %203 : vector<8x8xf32>
    %205 = math.exp %204 : vector<8x8xf32>
    %cst_85 = arith.constant dense<0.000000e+00> : vector<8xf32>
    %206 = vector.multi_reduction <add>, %205, %cst_85 [1] : vector<8x8xf32> to vector<8xf32>
    %207 = vector.shape_cast %206 : vector<8xf32> to vector<8x1xf32>
    %208 = vector.broadcast %207 : vector<8x1xf32> to vector<8x8xf32>
    %209 = arith.divf %205, %208 : vector<8x8xf32>
    %210 = arith.truncf %209 : vector<8x8xf32> to vector<8x8xbf16>
    %211 = vector.extract_strided_slice %176 {offsets = [0, 8], sizes = [8, 8], strides = [1, 1]} : vector<8x32xbf16> to vector<8x8xbf16>
    %cst_86 = arith.constant dense<0.000000e+00> : vector<8x8xf32>
    %212 = tpu.matmul %210, %211, %cst_86 {dimension_numbers = #tpu.dot_dimension_numbers<[1], [0], [0], [1], [0, 0, 1, 1], [], []>} : vector<8x8xbf16>, vector<8x8xbf16>, vector<8x8xf32> -> vector<8x8xf32>
    %213 = arith.truncf %212 : vector<8x8xf32> to vector<8x8xbf16>
    %c0_87 = arith.constant 0 : index
    %c8_88 = arith.constant 8 : index
    %214 = vector.load %arg26[%c0_87, %c8_88] : memref<8x32xbf16, #tpu.memory_space<vmem>>, vector<8x8xbf16>
    tpu.vector_store %arg26[%c0_87, %c8_88], %213 {strides = array<i32>} : memref<8x32xbf16, #tpu.memory_space<vmem>>, vector<8x8xbf16>,
    %215 = vector.extract_strided_slice %167 {offsets = [0, 16], sizes = [8, 8], strides = [1, 1]} : vector<8x32xbf16> to vector<8x8xbf16>
    %216 = vector.extract_strided_slice %174 {offsets = [0, 16], sizes = [8, 8], strides = [1, 1]} : vector<8x32xbf16> to vector<8x8xbf16>
    %cst_89 = arith.constant dense<0.000000e+00> : vector<8x8xf32>
    %217 = tpu.matmul %215, %216, %cst_89 {dimension_numbers = #tpu.dot_dimension_numbers<[1], [1], [0], [0], [0, 0, 1, 0], [], []>} : vector<8x8xbf16>, vector<8x8xbf16>, vector<8x8xf32> -> vector<8x8xf32>
    %218 = vector.broadcast %17 : vector<1x8xf32> to vector<8x8xf32>
    %219 = arith.addf %217, %218 : vector<8x8xf32>
    %cst_90 = arith.constant dense<0xFF800000> : vector<8xf32>
    %220 = vector.multi_reduction <maximumf>, %219, %cst_90 [1] : vector<8x8xf32> to vector<8xf32>
    %221 = vector.shape_cast %220 : vector<8xf32> to vector<8x1xf32>
    %222 = vector.broadcast %221 : vector<8x1xf32> to vector<8x8xf32>
    %223 = arith.subf %219, %222 : vector<8x8xf32>
    %224 = math.exp %223 : vector<8x8xf32>
    %cst_91 = arith.constant dense<0.000000e+00> : vector<8xf32>
    %225 = vector.multi_reduction <add>, %224, %cst_91 [1] : vector<8x8xf32> to vector<8xf32>
    %226 = vector.shape_cast %225 : vector<8xf32> to vector<8x1xf32>
    %227 = vector.broadcast %226 : vector<8x1xf32> to vector<8x8xf32>
    %228 = arith.divf %224, %227 : vector<8x8xf32>
    %229 = arith.truncf %228 : vector<8x8xf32> to vector<8x8xbf16>
    %230 = vector.extract_strided_slice %176 {offsets = [0, 16], sizes = [8, 8], strides = [1, 1]} : vector<8x32xbf16> to vector<8x8xbf16>
    %cst_92 = arith.constant dense<0.000000e+00> : vector<8x8xf32>
    %231 = tpu.matmul %229, %230, %cst_92 {dimension_numbers = #tpu.dot_dimension_numbers<[1], [0], [0], [1], [0, 0, 1, 1], [], []>} : vector<8x8xbf16>, vector<8x8xbf16>, vector<8x8xf32> -> vector<8x8xf32>
    %232 = arith.truncf %231 : vector<8x8xf32> to vector<8x8xbf16>
    %c0_93 = arith.constant 0 : index
    %c16_94 = arith.constant 16 : index
    %233 = vector.load %arg26[%c0_93, %c16_94] : memref<8x32xbf16, #tpu.memory_space<vmem>>, vector<8x8xbf16>
    tpu.vector_store %arg26[%c0_93, %c16_94], %232 {strides = array<i32>} : memref<8x32xbf16, #tpu.memory_space<vmem>>, vector<8x8xbf16>,
    %234 = vector.extract_strided_slice %167 {offsets = [0, 24], sizes = [8, 8], strides = [1, 1]} : vector<8x32xbf16> to vector<8x8xbf16>
    %235 = vector.extract_strided_slice %174 {offsets = [0, 24], sizes = [8, 8], strides = [1, 1]} : vector<8x32xbf16> to vector<8x8xbf16>
    %cst_95 = arith.constant dense<0.000000e+00> : vector<8x8xf32>
    %236 = tpu.matmul %234, %235, %cst_95 {dimension_numbers = #tpu.dot_dimension_numbers<[1], [1], [0], [0], [0, 0, 1, 0], [], []>} : vector<8x8xbf16>, vector<8x8xbf16>, vector<8x8xf32> -> vector<8x8xf32>
    %237 = vector.broadcast %17 : vector<1x8xf32> to vector<8x8xf32>
    %238 = arith.addf %236, %237 : vector<8x8xf32>
    %cst_96 = arith.constant dense<0xFF800000> : vector<8xf32>
    %239 = vector.multi_reduction <maximumf>, %238, %cst_96 [1] : vector<8x8xf32> to vector<8xf32>
    %240 = vector.shape_cast %239 : vector<8xf32> to vector<8x1xf32>
    %241 = vector.broadcast %240 : vector<8x1xf32> to vector<8x8xf32>
    %242 = arith.subf %238, %241 : vector<8x8xf32>
    %243 = math.exp %242 : vector<8x8xf32>
    %cst_97 = arith.constant dense<0.000000e+00> : vector<8xf32>
    %244 = vector.multi_reduction <add>, %243, %cst_97 [1] : vector<8x8xf32> to vector<8xf32>
    %245 = vector.shape_cast %244 : vector<8xf32> to vector<8x1xf32>
    %246 = vector.broadcast %245 : vector<8x1xf32> to vector<8x8xf32>
    %247 = arith.divf %243, %246 : vector<8x8xf32>
    %248 = arith.truncf %247 : vector<8x8xf32> to vector<8x8xbf16>
    %249 = vector.extract_strided_slice %176 {offsets = [0, 24], sizes = [8, 8], strides = [1, 1]} : vector<8x32xbf16> to vector<8x8xbf16>
    %cst_98 = arith.constant dense<0.000000e+00> : vector<8x8xf32>
    %250 = tpu.matmul %248, %249, %cst_98 {dimension_numbers = #tpu.dot_dimension_numbers<[1], [0], [0], [1], [0, 0, 1, 1], [], []>} : vector<8x8xbf16>, vector<8x8xbf16>, vector<8x8xf32> -> vector<8x8xf32>
    %251 = arith.truncf %250 : vector<8x8xf32> to vector<8x8xbf16>
    %c0_99 = arith.constant 0 : index
    %c24_100 = arith.constant 24 : index
    %252 = vector.load %arg26[%c0_99, %c24_100] : memref<8x32xbf16, #tpu.memory_space<vmem>>, vector<8x8xbf16>
    tpu.vector_store %arg26[%c0_99, %c24_100], %251 {strides = array<i32>} : memref<8x32xbf16, #tpu.memory_space<vmem>>, vector<8x8xbf16>,
    %c0_101 = arith.constant 0 : index
    %c0_102 = arith.constant 0 : index
    %253 = vector.load %arg26[%c0_101, %c0_102] : memref<8x32xbf16, #tpu.memory_space<vmem>>, vector<8x32xbf16>
    %c0_103 = arith.constant 0 : index
    %c0_104 = arith.constant 0 : index
    %254 = vector.load %arg15[%c0_103, %c0_104] : memref<32x32xbf16, #tpu.memory_space<vmem>>, vector<32x32xbf16>
    %cst_105 = arith.constant dense<0.000000e+00> : vector<8x32xf32>
    %255 = tpu.matmul %253, %254, %cst_105 {dimension_numbers = #tpu.dot_dimension_numbers<[1], [0], [0], [1], [0, 0, 1, 1], [], []>} : vector<8x32xbf16>, vector<32x32xbf16>, vector<8x32xf32> -> vector<8x32xf32>
    %c0_106 = arith.constant 0 : index
    %c0_107 = arith.constant 0 : index
    %256 = vector.load %arg16[%c0_106, %c0_107] : memref<1x32xf32, #tpu.memory_space<vmem>>, vector<1x32xf32>
    %257 = vector.broadcast %256 : vector<1x32xf32> to vector<8x32xf32>
    %258 = arith.addf %255, %257 : vector<8x32xf32>
    %259 = arith.addf %134, %258 : vector<8x32xf32>
    %c0_108 = arith.constant 0 : index
    %c0_109 = arith.constant 0 : index
    %260 = vector.load %arg23[%c0_108, %c0_109] : memref<1x32xf32, #tpu.memory_space<vmem>>, vector<1x32xf32>
    %c0_110 = arith.constant 0 : index
    %c0_111 = arith.constant 0 : index
    %261 = vector.load %arg24[%c0_110, %c0_111] : memref<1x32xf32, #tpu.memory_space<vmem>>, vector<1x32xf32>
    %cst_112 = arith.constant dense<0.000000e+00> : vector<8xf32>
    %262 = vector.multi_reduction <add>, %259, %cst_112 [1] : vector<8x32xf32> to vector<8xf32>
    %263 = vector.shape_cast %262 : vector<8xf32> to vector<8x1xf32>
    %cst_113 = arith.constant 3.200000e+01 : f32
    %264 = vector.broadcast %cst_113 : f32 to vector<8x1xf32>
    %265 = arith.divf %263, %264 : vector<8x1xf32>
    %266 = vector.broadcast %265 : vector<8x1xf32> to vector<8x32xf32>
    %267 = arith.subf %259, %266 : vector<8x32xf32>
    %268 = arith.mulf %267, %267 : vector<8x32xf32>
    %cst_114 = arith.constant dense<0.000000e+00> : vector<8xf32>
    %269 = vector.multi_reduction <add>, %268, %cst_114 [1] : vector<8x32xf32> to vector<8xf32>
    %270 = vector.shape_cast %269 : vector<8xf32> to vector<8x1xf32>
    %cst_115 = arith.constant 3.200000e+01 : f32
    %271 = vector.broadcast %cst_115 : f32 to vector<8x1xf32>
    %272 = arith.divf %270, %271 : vector<8x1xf32>
    %273 = vector.broadcast %265 : vector<8x1xf32> to vector<8x32xf32>
    %274 = arith.subf %259, %273 : vector<8x32xf32>
    %275 = vector.broadcast %260 : vector<1x32xf32> to vector<8x32xf32>
    %276 = arith.mulf %275, %274 : vector<8x32xf32>
    %cst_116 = arith.constant 9.99999997E-7 : f32
    %277 = vector.broadcast %cst_116 : f32 to vector<8x1xf32>
    %278 = arith.addf %272, %277 : vector<8x1xf32>
    %279 = math.rsqrt %278 : vector<8x1xf32>
    %280 = vector.broadcast %279 : vector<8x1xf32> to vector<8x32xf32>
    %281 = arith.mulf %276, %280 : vector<8x32xf32>
    %282 = vector.broadcast %261 : vector<1x32xf32> to vector<8x32xf32>
    %283 = arith.addf %281, %282 : vector<8x32xf32>
    %284 = arith.truncf %283 : vector<8x32xf32> to vector<8x32xbf16>
    %cst_117 = arith.constant 0.000000e+00 : f32
    %285 = vector.broadcast %cst_117 : f32 to vector<8x32xf32>
    %c0_118 = arith.constant 0 : index
    %c0_119 = arith.constant 0 : index
    %286 = vector.load %arg19[%c0_118, %c0_119] : memref<32x64xbf16, #tpu.memory_space<vmem>>, vector<32x64xbf16>
    %cst_120 = arith.constant dense<0.000000e+00> : vector<8x64xf32>
    %287 = tpu.matmul %284, %286, %cst_120 {dimension_numbers = #tpu.dot_dimension_numbers<[1], [0], [0], [1], [0, 0, 1, 1], [], []>} : vector<8x32xbf16>, vector<32x64xbf16>, vector<8x64xf32> -> vector<8x64xf32>
    %c0_121 = arith.constant 0 : index
    %c0_122 = arith.constant 0 : index
    %288 = vector.load %arg20[%c0_121, %c0_122] : memref<1x64xf32, #tpu.memory_space<vmem>>, vector<1x64xf32>
    %289 = vector.broadcast %288 : vector<1x64xf32> to vector<8x64xf32>
    %290 = arith.addf %287, %289 : vector<8x64xf32>
    %cst_123 = arith.constant 0.000000e+00 : f32
    %291 = vector.broadcast %cst_123 : f32 to vector<8x64xf32>
    %292 = arith.maximumf %290, %291 : vector<8x64xf32>
    %293 = arith.truncf %292 : vector<8x64xf32> to vector<8x64xbf16>
    %c0_124 = arith.constant 0 : index
    %c0_125 = arith.constant 0 : index
    %294 = vector.load %arg21[%c0_124, %c0_125] : memref<64x32xbf16, #tpu.memory_space<vmem>>, vector<64x32xbf16>
    %cst_126 = arith.constant dense<0.000000e+00> : vector<8x32xf32>
    %295 = tpu.matmul %293, %294, %cst_126 {dimension_numbers = #tpu.dot_dimension_numbers<[1], [0], [0], [1], [0, 0, 1, 1], [], []>} : vector<8x64xbf16>, vector<64x32xbf16>, vector<8x32xf32> -> vector<8x32xf32>
    %296 = arith.addf %285, %295 : vector<8x32xf32>
    %297 = arith.addf %259, %296 : vector<8x32xf32>
    %c0_127 = arith.constant 0 : index
    %c0_128 = arith.constant 0 : index
    %298 = vector.load %arg22[%c0_127, %c0_128] : memref<1x32xf32, #tpu.memory_space<vmem>>, vector<1x32xf32>
    %299 = vector.broadcast %298 : vector<1x32xf32> to vector<8x32xf32>
    %300 = arith.addf %297, %299 : vector<8x32xf32>
    %c0_129 = arith.constant 0 : index
    %c0_130 = arith.constant 0 : index
    %c0_131 = arith.constant 0 : index
    %301 = vector.load %arg25[%c0_129, %c0_130, %c0_131] : memref<1x8x32xf32, #tpu.memory_space<vmem>>, vector<1x8x32xf32>
    %302 = vector.shape_cast %301 : vector<1x8x32xf32> to vector<8x32xf32>
    %303 = vector.shape_cast %300 : vector<8x32xf32> to vector<1x8x32xf32>
    tpu.vector_store %arg25[%c0_129, %c0_130, %c0_131], %303 {strides = array<i32>} : memref<1x8x32xf32, #tpu.memory_space<vmem>>, vector<1x8x32xf32>,
    return
  }
  func.func @transform_0(%arg0: i32) -> (i32, i32, i32) {
    %c0_i32 = arith.constant 0 : i32
    %c0_i32_0 = arith.constant 0 : i32
    %c0_i32_1 = arith.constant 0 : i32
    return %arg0, %c0_i32, %c0_i32_0 : i32, i32, i32
  }
  func.func @transform_1(%arg0: i32) -> (i32, i32, i32) {
    %c0_i32 = arith.constant 0 : i32
    %c0_i32_0 = arith.constant 0 : i32
    %c0_i32_1 = arith.constant 0 : i32
    return %arg0, %c0_i32, %c0_i32_0 : i32, i32, i32
  }
  func.func @transform_2(%arg0: i32) -> (i32, i32, i32) {
    %c0_i32 = arith.constant 0 : i32
    %c0_i32_0 = arith.constant 0 : i32
    %c0_i32_1 = arith.constant 0 : i32
    return %arg0, %c0_i32, %c0_i32_0 : i32, i32, i32
  }
  func.func @transform_3(%arg0: i32) -> (i32, i32, i32) {
    %c0_i32 = arith.constant 0 : i32
    %c0_i32_0 = arith.constant 0 : i32
    %c0_i32_1 = arith.constant 0 : i32
    return %arg0, %c0_i32, %c0_i32_0 : i32, i32, i32
  }
  func.func @transform_4(%arg0: i32) -> (i32, i32) {
    %c0_i32 = arith.constant 0 : i32
    %c0_i32_0 = arith.constant 0 : i32
    %c0_i32_1 = arith.constant 0 : i32
    return %c0_i32, %c0_i32_0 : i32, i32
  }
  func.func @transform_5(%arg0: i32) -> (i32, i32) {
    %c0_i32 = arith.constant 0 : i32
    %c0_i32_0 = arith.constant 0 : i32
    %c0_i32_1 = arith.constant 0 : i32
    return %c0_i32, %c0_i32_0 : i32, i32
  }
  func.func @transform_6(%arg0: i32) -> (i32, i32) {
    %c0_i32 = arith.constant 0 : i32
    %c0_i32_0 = arith.constant 0 : i32
    %c0_i32_1 = arith.constant 0 : i32
    return %c0_i32, %c0_i32_0 : i32, i32
  }
  func.func @transform_7(%arg0: i32) -> (i32, i32) {
    %c0_i32 = arith.constant 0 : i32
    %c0_i32_0 = arith.constant 0 : i32
    %c0_i32_1 = arith.constant 0 : i32
    return %c0_i32, %c0_i32_0 : i32, i32
  }
  func.func @transform_8(%arg0: i32) -> (i32, i32) {
    %c0_i32 = arith.constant 0 : i32
    %c0_i32_0 = arith.constant 0 : i32
    %c0_i32_1 = arith.constant 0 : i32
    return %c0_i32, %c0_i32_0 : i32, i32
  }
  func.func @transform_9(%arg0: i32) -> (i32, i32) {
    %c0_i32 = arith.constant 0 : i32
    %c0_i32_0 = arith.constant 0 : i32
    %c0_i32_1 = arith.constant 0 : i32
    return %c0_i32, %c0_i32_0 : i32, i32
  }
  func.func @transform_10(%arg0: i32) -> (i32, i32) {
    %c0_i32 = arith.constant 0 : i32
    %c0_i32_0 = arith.constant 0 : i32
    %c0_i32_1 = arith.constant 0 : i32
    return %c0_i32, %c0_i32_0 : i32, i32
  }
  func.func @transform_11(%arg0: i32) -> (i32, i32) {
    %c0_i32 = arith.constant 0 : i32
    %c0_i32_0 = arith.constant 0 : i32
    %c0_i32_1 = arith.constant 0 : i32
    return %c0_i32, %c0_i32_0 : i32, i32
  }
  func.func @transform_12(%arg0: i32) -> (i32, i32) {
    %c0_i32 = arith.constant 0 : i32
    %c0_i32_0 = arith.constant 0 : i32
    %c0_i32_1 = arith.constant 0 : i32
    return %c0_i32, %c0_i32_0 : i32, i32
  }
  func.func @transform_13(%arg0: i32) -> (i32, i32) {
    %c0_i32 = arith.constant 0 : i32
    %c0_i32_0 = arith.constant 0 : i32
    %c0_i32_1 = arith.constant 0 : i32
    return %c0_i32, %c0_i32_0 : i32, i32
  }
  func.func @transform_14(%arg0: i32) -> (i32, i32) {
    %c0_i32 = arith.constant 0 : i32
    %c0_i32_0 = arith.constant 0 : i32
    %c0_i32_1 = arith.constant 0 : i32
    return %c0_i32, %c0_i32_0 : i32, i32
  }
  func.func @transform_15(%arg0: i32) -> (i32, i32) {
    %c0_i32 = arith.constant 0 : i32
    %c0_i32_0 = arith.constant 0 : i32
    %c0_i32_1 = arith.constant 0 : i32
    return %c0_i32, %c0_i32_0 : i32, i32
  }
  func.func @transform_16(%arg0: i32) -> (i32, i32) {
    %c0_i32 = arith.constant 0 : i32
    %c0_i32_0 = arith.constant 0 : i32
    %c0_i32_1 = arith.constant 0 : i32
    return %c0_i32, %c0_i32_0 : i32, i32
  }
  func.func @transform_17(%arg0: i32) -> (i32, i32) {
    %c0_i32 = arith.constant 0 : i32
    %c0_i32_0 = arith.constant 0 : i32
    %c0_i32_1 = arith.constant 0 : i32
    return %c0_i32, %c0_i32_0 : i32, i32
  }
  func.func @transform_18(%arg0: i32) -> (i32, i32) {
    %c0_i32 = arith.constant 0 : i32
    %c0_i32_0 = arith.constant 0 : i32
    %c0_i32_1 = arith.constant 0 : i32
    return %c0_i32, %c0_i32_0 : i32, i32
  }
  func.func @transform_19(%arg0: i32) -> (i32, i32) {
    %c0_i32 = arith.constant 0 : i32
    %c0_i32_0 = arith.constant 0 : i32
    %c0_i32_1 = arith.constant 0 : i32
    return %c0_i32, %c0_i32_0 : i32, i32
  }
  func.func @transform_20(%arg0: i32) -> (i32, i32) {
    %c0_i32 = arith.constant 0 : i32
    %c0_i32_0 = arith.constant 0 : i32
    %c0_i32_1 = arith.constant 0 : i32
    return %c0_i32, %c0_i32_0 : i32, i32
  }
  func.func @transform_21(%arg0: i32) -> (i32, i32) {
    %c0_i32 = arith.constant 0 : i32
    %c0_i32_0 = arith.constant 0 : i32
    %c0_i32_1 = arith.constant 0 : i32
    return %c0_i32, %c0_i32_0 : i32, i32
  }
  func.func @transform_22(%arg0: i32) -> (i32, i32) {
    %c0_i32 = arith.constant 0 : i32
    %c0_i32_0 = arith.constant 0 : i32
    %c0_i32_1 = arith.constant 0 : i32
    return %c0_i32, %c0_i32_0 : i32, i32
  }
  func.func @transform_23(%arg0: i32) -> (i32, i32) {
    %c0_i32 = arith.constant 0 : i32
    %c0_i32_0 = arith.constant 0 : i32
    %c0_i32_1 = arith.constant 0 : i32
    return %c0_i32, %c0_i32_0 : i32, i32
  }
  func.func @transform_24(%arg0: i32) -> (i32, i32, i32) {
    %c0_i32 = arith.constant 0 : i32
    %c0_i32_0 = arith.constant 0 : i32
    %c0_i32_1 = arith.constant 0 : i32
    return %arg0, %c0_i32, %c0_i32_0 : i32, i32, i32
  }
}

</mosaic_0001>

<bundles_post_ra>
// kernel: decoder_block.1
= control target key start
LH: loop header
LB: loop body
LE: loop exit
PB: predicated region body
PF: predicated region fallthrough
CT: control target
= control target key end

     0   :  { %s3574_s0 = inlined_call_operand.hbm [shape: f32[2,8,32], index: 0, kind: input, shape index: {}, may-alias: {0,24}]   ;;  %s3575_s1 = inlined_call_operand.vmem [shape: bf16[2,8,32], index: 1, kind: input, shape index: {}]   ;;  %s3576_s2 = inlined_call_operand.vmem [shape: bf16[2,8,8], index: 2, kind: input, shape index: {}]   ;;  %s3577_s3 = inlined_call_operand.vmem [shape: bf16[2,1,8], index: 3, kind: input, shape index: {}]   ;;  %s3578_s4 = inlined_call_operand.vmem [shape: bf16[32,96], index: 4, kind: input, shape index: {}]   ;;  %s3579_s5 = inlined_call_operand.vmem [shape: f32[1,96], index: 5, kind: input, shape index: {}]   ;;  %s3580_s6 = inlined_call_operand.vmem [shape: bf16[32,32], index: 6, kind: input, shape index: {}]   ;;  %s3581_s7 = inlined_call_operand.vmem [shape: f32[1,32], index: 7, kind: input, shape index: {}]   ;;  %s3582_s8 = inlined_call_operand.vmem [shape: f32[1,32], index: 8, kind: input, shape index: {}]   ;;  %s3583_s9 = inlined_call_operand.vmem [shape: f32[1,32], index: 9, kind: input, shape index: {}]   ;;  %s3584_s10 = inlined_call_operand.vmem [shape: bf16[32,32], index: 10, kind: input, shape index: {}]   ;;  %s3585_s11 = inlined_call_operand.vmem [shape: f32[1,32], index: 11, kind: input, shape index: {}]   ;;  %s3586_s12 = inlined_call_operand.vmem [shape: bf16[32,64], index: 12, kind: input, shape index: {}]   ;;  %s3587_s13 = inlined_call_operand.vmem [shape: f32[1,64], index: 13, kind: input, shape index: {}]   ;;  %s3588_s14 = inlined_call_operand.vmem [shape: bf16[32,32], index: 14, kind: input, shape index: {}]   ;;  %s3589_s15 = inlined_call_operand.vmem [shape: f32[1,32], index: 15, kind: input, shape index: {}]   ;;  %s3590_s16 = inlined_call_operand.vmem [shape: f32[1,32], index: 16, kind: input, shape index: {}]   ;;  %s3591_s17 = inlined_call_operand.vmem [shape: f32[1,32], index: 17, kind: input, shape index: {}]   ;;  %s3592_s18 = inlined_call_operand.vmem [shape: bf16[32,64], index: 18, kind: input, shape index: {}]   ;;  %s3593_s19 = inlined_call_operand.vmem [shape: f32[1,64], index: 19, kind: input, shape index: {}]   ;;  %s3594_s20 = inlined_call_operand.vmem [shape: bf16[64,32], index: 20, kind: input, shape index: {}]   ;;  %s3595_s21 = inlined_call_operand.vmem [shape: f32[1,32], index: 21, kind: input, shape index: {}]   ;;  %s3596_s22 = inlined_call_operand.vmem [shape: f32[1,32], index: 22, kind: input, shape index: {}]   ;;  %s3597_s23 = inlined_call_operand.vmem [shape: f32[1,32], index: 23, kind: input, shape index: {}]   ;;  %s3598_s24 = inlined_call_operand.hbm [shape: f32[2,8,32], index: 24, kind: output, shape index: {}, may-alias: {0,24}]  }
   0x1   :  { %3624 = sst [smem:[#allocation13_spill]] %s3574_s0 }
   0x2   :  { %3625 = sst [smem:[#allocation14_spill]] %s3575_s1 }
   0x3   :  { %3626 = sst [smem:[#allocation15_spill]] %s3576_s2 }
   0x4   :  { %3627 = sst [smem:[#allocation16_spill]] %s3577_s3 }
   0x5   :  { %3628 = sst [smem:[#allocation17_spill]] %s3578_s4 }
   0x6   :  { %3629 = sst [smem:[#allocation18_spill]] %s3579_s5 }
   0x7   :  { %3630 = sst [smem:[#allocation19_spill]] %s3580_s6 }
   0x8   :  { %3631 = sst [smem:[#allocation20_spill]] %s3581_s7 }
   0x9   :  { %3632 = sst [smem:[#allocation21_spill]] %s3582_s8 }
   0xa   :  { %3633 = sst [smem:[#allocation22_spill]] %s3583_s9 }
   0xb   :  { %3634 = sst [smem:[#allocation23_spill]] %s3584_s10 }
   0xc   :  { %3635 = sst [smem:[#allocation24_spill]] %s3593_s19 }
   0xd   :  { %3636 = sst [smem:[#allocation25_spill]] %s3595_s21 }
   0xe   :  { %3637 = sst [smem:[#allocation26_spill]] %s3598_s24 }
   0xf   :  { %29 = vsyncpa [#allocation4], 0 }
  0x10   :  { %31 = vsyncpa [#allocation4 + $0x1], 0 }
  0x11   :  { %32 = vsyncpa [#allocation5], 0 }
  0x12   :  { %34 = vsyncpa [#allocation5 + $0x1], 0  ;;  %s3103_s5 = smov 0   ;;  %s3105_s26 = smov 0  }
  0x13   :  { %s3107_s27 = smov 0   ;;  %s3109_s28 = smov 0  }
  0x14 LB: > { %3638 = sst [smem:[#allocation9_spill]] %s2946_s5  ;;  %s3124_s6 = sadd.s32 4294967295, %s2958_s28   ;;  %s2958_s28 = sphi %s3109_s28, %s3680_s28   ;;  %s2954_s27 = sphi %s3107_s27, %s3684_s27   ;;  %s2950_s26 = sphi %s3105_s26, %s3683_s26   ;;  %s2946_s5 = sphi %s3103_s5, %s3682_s5  }
  0x15   : > { %s2455_s2 = sadd.s32 4294967294, %s2958_s28   ;;  %s3128_s29 = sadd.s32 1, %s2958_s28  }
  0x16   : > { %3639 = sst [smem:[#allocation10_spill]] %s3128_s29  ;;  %s47_s0 = sadd.s32 1, %s2954_s27 }
  0x17   : > { %s44_s7 = ssub.s32 %s2958_s28, %s3128_s29  ;;  %p54_p0 = scmp.ne.s32.totalorder %s2954_s27, %s2950_s26 }
  0x18   : > { %p45_p1 = scmp.eq.s32.totalorder %s44_s7, 0  ;;  %p55_p2 = scmp.eq.s32.totalorder %s2958_s28, 0 }
  0x19   : > { %p60_p3 = scmp.ne.s32.totalorder %s2950_s26, %s2946_s5  ;;  %p61_p4 = scmp.eq.s32.totalorder %s3124_s6, 0 }
  0x1a   : > { %s3140_s30 = scalar_select %p45_p1, %s2954_s27, %s47_s0  }
  0x1b   : > { %p3142_p5 = por %p55_p2, %p54_p0  ;;  %p3146_p6 = por %p61_p4, %p60_p3 }
  0x1c   : > { %3640 = sst [smem:[#allocation11_spill]] %s3140_s30  ;;  %p582_p7 = scmp.eq.s32.totalorder %s3124_s6, 1 }
  0x1d   : > { %p588_p8 = scmp.eq.s32.totalorder %s2455_s2, 1  ;;  %p2758_p10 = scmp.lt.s32.totalorder %s2958_s28, 2 }
  0x1e   : > { %p3153_p11 = por %p582_p7, %p54_p0  ;;  %s668_s1 = sand.u32 1, %s2954_s27  }
  0x1f   : > { %p3157_p12 = por %p588_p8, %p60_p3  ;;  %s2459_s0 = sshll.u32 %s2958_s28, 7 }
  0x20   : > { %s3643_s8 = scalar_select %p3153_p11, 1, 0 }
  0x21   : > { %s3645_s4 = scalar_select %p3157_p12, 1, 0 }
  0x22   : > { %3644 = sst [smem:[#allocation12_spill]] %s3643_s8  ;;  %s2458_s7 = sshll.u32 %s668_s1, 3 }
  0x23   : > { %s3646_s5 = sld [smem:[#allocation13_spill]]  ;;  %s672_s2 = scalar_lea.vmem [#allocation3], %s2458_s7 }
  0x24   : > { %s679_s19 = sshll.u32 %s672_s2, 4  ;;  %p3170_p13 = pnand %p2758_p10, %p3142_p5  ;;  %s3174_s19 = int_to_ptr.vmem [resolvable:$true] %s679_s19 }
  0x25   : > { %s669_s29 = scalar_lea.sflag [#allocation4], %s668_s1 }
  0x26   : > { %p2864_p3 = pneg %p3170_p13 }
  0x29   : > { %s3647_s24 = smov %s3646_s5  ;;  %s3166_s21 = scalar_lea.hbm %s3646_s5, %s2459_s0 }
  0x2a   : > { %s2862_s5 = scalar_lea.hbm %s3166_s21, 128  ;;  %s2867_s0 = scalar_lea.hbm %s3647_s24, 256 }
  0x2b   : > { %p2863_p2 = scmp.ne.s32.totalorder %s3166_s21, %s2862_s5  ;;  %p2868_p5 = scmp.lt.u32.totalorder %s3166_s21, %s3647_s24 }
  0x2c   : > { %p2869_p8 = scmp.lt.u32.totalorder %s2867_s0, %s2862_s5  ;;  %p2871_p9 = scmp.lt.u32.totalorder %s2862_s5, %s3166_s21 }
  0x2d   : > { %p2865_p4 = pnand %p2864_p3, %p2863_p2 }
  0x2e   : > { %p2870_p10 = por %p2869_p8, %p2868_p5 }
  0x2f   : > { %p2866_p7 = pneg %p2865_p4 }
  0x30   : > { %p2872_p0 = por %p2871_p9, %p2870_p10 }
  0x32   : > { %p2873_p1 = pnand %p2872_p0, %p2866_p7 }
  0x34   : > { %2876 = shalt.err (!%p2873_p1)
}
  0x35   : > { %s2877_s1 = scalar_lea.vmem %s3174_s19, 128  ;;  %s2960_s30 = smov [#allocation3]  }
  0x36   : > { %p2878_p2 = scmp.ne.s32.totalorder %s3174_s19, %s2877_s1  ;;  %s2882_s3 = sshll.u32 %s2960_s30, 4  ;;  %s2883_s3 = int_to_ptr.vmem [resolvable:$false] %s2882_s3 }
  0x37   : > { %s2884_s7 = scalar_lea.vmem %s2883_s3, 256  ;;  %p2885_p11 = scmp.lt.s32.totalorder %s3174_s19, %s2883_s3 }
  0x38   : > { %p2880_p4 = pnand %p2878_p2, %p2864_p3  ;;  %p2886_p5 = scmp.lt.s32.totalorder %s2884_s7, %s2877_s1 }
  0x3a   : > { %p2881_p12 = pneg %p2880_p4  ;;  %p2887_p8 = por %p2886_p5, %p2885_p11 }
  0x3c   : > { %p2888_p9 = pnand %p2887_p8, %p2881_p12 }
  0x3e   : > { %2891 = shalt.err (!%p2888_p9)
}
  0x3f   : > { %2753 = dma.hbm_to_vmem [thread:$0]  (!%p3170_p13), %s3166_s21, 128, %s3174_s19, %s669_s29  }
  0x40   : > { %p3649_p0 = scmp.lt.s32.totalorder %s2958_s28, 3  ;;  %p3650_p1 = scmp.ge.s32.totalorder %s2958_s28, 1 }
  0x42   : > { %p705_p3 = pnand %p3650_p1, %p3649_p0 }
  0x43   : > { %s3208_s5 = sand.u32 (!%p705_p3), 1, %s2950_s26  }
  0x44   : > { %708 = sbr.rel (%p705_p3) target bundleno = 4417 (0x1141), region = 116  ;;  %s3609_s0 = sshll.u32 (!%p705_p3), %s3208_s5, 3 }
  0x45   : > { %s711_s2 = scalar_lea.sflag (!%p705_p3), [#allocation4], %s3208_s5  ;;  %s714_s8 = scalar_lea.vmem (!%p705_p3), [#allocation3], %s3609_s0 }
  0x4b   : > { %2937 = dma.done.wait (%p3146_p6), %s711_s2, 128  }
  0x4c   : > { %2939 = vsyncadd (%p3146_p6), %s711_s2, 4294967168  ;;  %vm814_vm0 = vcmask 261120   ;;  %v3218_v0 = vld [vmem:[%s714_s8] sm:$0xff]  ;;  %s3651_s29 = sld [smem:[#allocation17_spill]]  ;;  %v2961_v8 = vmov 0.0   ;;  %vm2962_vm1 = vmmov 0  }
  0x4d   : > { %v815_v1 = vsel %vm814_vm0, %v3218_v0, 0.0  ;;  %2590 = vmatprep.subr.bf16.mxu1 %v2961_v8  ;;  %2594 = vmatprep.mubr.msk.bf16.mxu1 %vm2962_vm1, %v2961_v8  ;;  %s3652_s7 = sld [smem:[#allocation21_spill]]  ;;  %s3653_s9 = sld [smem:[#allocation22_spill]]  ;;  %vm916_vm2 = vcmask 64512   ;;  %vm980_vm3 = vcmask 1043456   ;;  %vm1025_vm4 = vcmask 60416  }
  0x4e   : > { %816 = vadd.xlane.f32.xlu0 %v815_v1  ;;  %2604 = vmatprep.subr.bf16.mxu0 %v2961_v8  ;;  %s3654_s25 = sld [smem:[#allocation18_spill]]  ;;  %s3612_s1 = smov 96   ;;  %vm1145_vm5 = vcmask 126016   ;;  %vm1264_vm6 = vcmask 191616   ;;  %vm1383_vm7 = vcmask 257216   ;;  %vm2284_vm8 = vcmask 523264  }
  0x4f   : > { %2606 = vmatprep.mubr.msk.bf16.mxu0 %vm2962_vm1, %v2961_v8  ;;  %s3621_s30 = smov 120   ;;  %s3613_s3 = smov 88  }
  0x50   : > { %s3616_s2 = smov 112   ;;  %s3611_s8 = smov 72  }
  0x51   : > { %s3614_s19 = smov 104   ;;  %p790_p6 = scmp.lt.s32.totalorder %s3124_s6, 1 }
  0x52   : > { %v2808_v7 = vld [vmem:[%s3651_s29] sm:$0xff]   ;;  %v2809_v9 = vld [vmem:[%s3651_s29 + $0x8] sm:$0xff]   ;;  %s2970_s0 = smov 64   ;;  %s3659_s10 = sld [smem:[#allocation23_spill]] }
  0x53   : > { %2591 = vmatpush3.bf16.msra.mxu1 %v2808_v7  ;;  %v2467_v13 = vld [vmem:[%s3652_s7] ss:$0 sm:$0xff]  ;;  %s3610_s7 = smov 80  }
  0x54   : > { %2592 = vmatprep.subr.bf16.mxu1 %v2961_v8  ;;  %v2468_v16 = vld [vmem:[%s3653_s9] ss:$0 sm:$0xff]  ;;  %s3285_s21 = scalar_select %p790_p6, %s3124_s6, 1 }
  0x55   : > { %v2469_v20 = vld [vmem:[%s3654_s25] ss:$0 sm:$0xff]  ;;  %s3675_s9 = sld [smem:[#allocation26_spill]] }
  0x56   : > { %s2463_s25 = sshll.u32 %s3285_s21, 2 }
  0x57   : > { %2593 = vmatpush3.bf16.msra.mxu1 %v2809_v9 }
  0x58   : > { %2598 = vmatprep.subr.bf16.mxu1 %v2961_v8 }
  0xdb   : > { %v817_v2 = vpop.xlane.xlu0 %816 }
  0xdc   : > { %v819_v3 = vmul.f32 0.03125, %v817_v2 }
  0xde   : > { %v820_v4 = vsub.f32 %v3218_v0, %v819_v3 }
  0xe0   : > { %v821_v5 = vmul.f32 %v820_v4, %v820_v4  ;;  %v832_v14 = vmul.f32 %v2467_v13, %v820_v4 }
  0xe2   : > { %v822_v6 = vsel %vm814_vm0, %v821_v5, 0.0 }
  0xe3   : > { %823 = vadd.xlane.f32.xlu0 %v822_v6 }
 0x170   : > { %v824_v10 = vpop.xlane.xlu0 %823 }
 0x171   : > { %v825_v11 = vmul.f32 0.03125, %v824_v10 }
 0x173   : > { %v833_v12 = vadd.f32 1e-06, %v825_v11 }
 0x175   : > { %2824 = vrsqrt.f32 %v833_v12 }
 0x17f   : > { %v2825_v15 = vpop.eup %2824 }
 0x180   : > { %v835_v17 = vmul.f32 %v2825_v15, %v832_v14 }
 0x182   : > { %v842_v18 = vadd.f32 %v2468_v16, %v835_v17 }
 0x184   : > { %v843_v19 = vpack.c.bf16 %v842_v18, %v842_v18 }
 0x186   : > { %2595 = vmatmul.mubr.msk.bf16.vlgmr.msra.gmra.mrb[0].mxu1 %vm814_vm0, %v843_v19 }
 0x187   : > { %2600 = vmatprep.mubr.msk.bf16.mxu1 %vm2962_vm1, %v2961_v8 }
 0x259   : > { %v904_v21 = vpop.f32.mrb[0].mxu1 }
 0x25a   : > { %v905_v22 = vadd.f32 %v2469_v20, %v904_v21  ;;  %v2596_v23 = vpop.f32.mrb[1].mxu1 }
 0x25b   : > { %v907_v24 = vpop.f32.mrb[2].mxu1 }
 0x25c   : > { %v910_v25 = vmul.f32 0.35355338, %v905_v22  ;;  %v3250_v26 = vpack.c.bf16 %v905_v22, %v905_v22  ;;  %v2597_v27 = vpop.f32.mrb[3].mxu1 }
 0x25e   : > { %v911_v28 = vpack.c.bf16 %v910_v25, %v910_v25  ;;  %914 = vrot.lane.b32.xlu1 %v3250_v26, %s3612_s1 }
 0x260   : > { %1028 = vrot.lane.b32.xlu0 %v911_v28, %s3621_s30  ;;  %s3658_s30 = sld [smem:[#allocation14_spill]] }
 0x262   : > { %1030 = vrot.lane.b32.xlu1 %v3250_v26, %s3613_s3 }
 0x266   : > { %1149 = vrot.lane.b32.xlu1 %v3250_v26, %s3610_s7  ;;  %s2972_s7 = smov 48  }
 0x26a   : > { %1147 = vrot.lane.b32.xlu1 %v911_v28, %s3616_s2  ;;  %s3619_s2 = smov 16  }
 0x26e   : > { %1268 = vrot.lane.b32.xlu1 %v3250_v26, %s3611_s8  ;;  %s3655_s8 = sld [smem:[#allocation15_spill]] }
 0x272   : > { %1266 = vrot.lane.b32.xlu1 %v911_v28, %s3614_s19  ;;  %s3660_s19 = smov 120  }
 0x274   : > { %s797_s1 = scalar_lea.vmem %s3655_s8, %s2463_s25  ;;  %s2973_s8 = smov 40  }
 0x275   : > { %v804_v40 = vld [vmem:[%s797_s1] sm:$0xf]  ;;  %s2971_s1 = smov 56  }
 0x276   : > { %v805_v41 = vunpack.c.l.bf16 %v804_v40 }
 0x278   : > { %v2465_v42 = vadd.f32 -1.0, %v805_v41 }
 0x27a   : > { %v807_v43 = vmul.f32 1e+09, %v2465_v42 }
 0x2d0   : > { %v915_v29 = vpop.permute.xlu1 %914 }
 0x2d1   : > { %v921_v30 = vsel %vm916_vm2, %v915_v29, 0 }
 0x2d2   : > { %2599 = vmatpush3.bf16.xpose.msra.mxu1 %v921_v30  ;;  %v1029_v34 = vpop.permute.xlu0 %1028 }
 0x2d3   : > { %2610 = vmatprep.subr.bf16.mxu1 %v2961_v8 }
 0x2d4   : > { %v1031_v31 = vpop.permute.xlu1 %1030 }
 0x2d5   : > { %v1036_v32 = vsel %vm916_vm2, %v1031_v31, 0 }
 0x2d8   : > { %v1150_v33 = vpop.permute.xlu1 %1149 }
 0x2d9   : > { %2601 = vmatmul.mubr.msk.bf16.vlgmr.msra.gmra.mrb[4].mxu1 %vm916_vm2, %v911_v28  ;;  %v1155_v36 = vsel %vm916_vm2, %v1150_v33, 0 }
 0x2da   : > { %2611 = vmatpush3.bf16.xpose.msra.mxu1 %v1036_v32  ;;  %2612 = vmatprep.mubr.msk.bf16.mxu1 %vm2962_vm1, %v2961_v8 }
 0x2db   : > { %2622 = vmatprep.subr.bf16.mxu1 %v2961_v8 }
 0x2dc   : > { %v1148_v35 = vpop.permute.xlu1 %1147 }
 0x2e0   : > { %v1269_v37 = vpop.permute.xlu1 %1268 }
 0x2e1   : > { %2613 = vmatmul.mubr.msk.bf16.vlgmr.msra.gmra.mrb[8].mxu1 %vm916_vm2, %v1029_v34  ;;  %v1274_v38 = vsel %vm916_vm2, %v1269_v37, 0 }
 0x2e2   : > { %2623 = vmatpush3.bf16.xpose.msra.mxu1 %v1155_v36  ;;  %2624 = vmatprep.mubr.msk.bf16.mxu1 %vm2962_vm1, %v2961_v8 }
 0x2e3   : > { %2634 = vmatprep.subr.bf16.mxu1 %v2961_v8 }
 0x2e4   : > { %v1267_v39 = vpop.permute.xlu1 %1266 }
 0x2e9   : > { %2625 = vmatmul.mubr.msk.bf16.vlgmr.msra.gmra.mrb[12].mxu1 %vm916_vm2, %v1148_v35 }
 0x2ea   : > { %2635 = vmatpush3.bf16.xpose.msra.mxu1 %v1274_v38  ;;  %2636 = vmatprep.mubr.msk.bf16.mxu1 %vm2962_vm1, %v2961_v8 }
 0x2eb   : > { %2646 = vmatprep.subr.bf16.mxu1 %v2961_v8 }
 0x2f1   : > { %2637 = vmatmul.mubr.msk.bf16.vlgmr.msra.gmra.mrb[16].mxu1 %vm916_vm2, %v1267_v39 }
 0x2f2   : > { %2650 = vmatprep.mubr.msk.bf16.mxu1 %vm2962_vm1, %v2961_v8 }
 0x3ac   : > { %v957_v44 = vpop.f32.mrb[4].mxu1 }
 0x3ad   : > { %v958_v45 = vadd.f32 %v957_v44, %v807_v43  ;;  %v2602_v46 = vpop.f32.mrb[5].mxu1 }
 0x3ae   : > { %v960_v47 = vpop.f32.mrb[6].mxu1 }
 0x3af   : > { %v2603_v48 = vpop.f32.mrb[7].mxu1  ;;  %v963_v49 = vsel %vm916_vm2, %v958_v45, -inf }
 0x3b0   : > { %964 = vmax.xlane.f32.xlu1 %v963_v49 }
 0x3b4   : > { %v1072_v50 = vpop.f32.mrb[8].mxu1 }
 0x3b5   : > { %v1073_v51 = vadd.f32 %v1072_v50, %v807_v43  ;;  %v2614_v52 = vpop.f32.mrb[9].mxu1 }
 0x3b6   : > { %v1075_v53 = vpop.f32.mrb[10].mxu1 }
 0x3b7   : > { %v2615_v54 = vpop.f32.mrb[11].mxu1  ;;  %v1078_v55 = vsel %vm916_vm2, %v1073_v51, -inf }
 0x3b8   : > { %1079 = vmax.xlane.f32.xlu0 %v1078_v55 }
 0x3bc   : > { %v1191_v56 = vpop.f32.mrb[12].mxu1 }
 0x3bd   : > { %v1192_v57 = vadd.f32 %v1191_v56, %v807_v43  ;;  %v2626_v58 = vpop.f32.mrb[13].mxu1 }
 0x3be   : > { %v1194_v59 = vpop.f32.mrb[14].mxu1 }
 0x3bf   : > { %v2627_v60 = vpop.f32.mrb[15].mxu1  ;;  %v1197_v61 = vsel %vm916_vm2, %v1192_v57, -inf }
 0x3c0   : > { %1198 = vmax.xlane.f32.xlu1 %v1197_v61 }
 0x3c4   : > { %v1310_v62 = vpop.f32.mrb[16].mxu1 }
 0x3c5   : > { %v1311_v63 = vadd.f32 %v1310_v62, %v807_v43  ;;  %v2638_v1 = vpop.f32.mrb[17].mxu1 }
 0x3c6   : > { %v1313_v2 = vpop.f32.mrb[18].mxu1 }
 0x3c7   : > { %v2639_v3 = vpop.f32.mrb[19].mxu1  ;;  %v1316_v4 = vsel %vm916_vm2, %v1311_v63, -inf }
 0x3c8   : > { %1317 = vmax.xlane.f32.xlu0 %v1316_v4 }
 0x43d   : > { %v965_v5 = vpop.xlane.xlu1 %964 }
 0x43e   : > { %v966_v6 = vsub.f32 %v958_v45, %v965_v5 }
 0x440   : > { %v967_v7 = vmul.f32 1.442695, %v966_v6 }
 0x442   : > { %2826 = vpow2.f32 %v967_v7 }
 0x445   : > { %v1080_v9 = vpop.xlane.xlu0 %1079 }
 0x446   : > { %v1081_v10 = vsub.f32 %v1073_v51, %v1080_v9 }
 0x448   : > { %v1082_v11 = vmul.f32 1.442695, %v1081_v10 }
 0x44a   : > { %2828 = vpow2.f32 %v1082_v11 }
 0x44c   : > { %v2827_v12 = vpop.eup %2826 }
 0x44d   : > { %v969_v13 = vsel %vm916_vm2, %v2827_v12, 0.0  ;;  %v1199_v21 = vpop.xlane.xlu1 %1198 }
 0x44e   : > { %970 = vadd.xlane.f32.xlu1 %v969_v13  ;;  %v1200_v22 = vsub.f32 %v1192_v57, %v1199_v21 }
 0x450   : > { %v1201_v23 = vmul.f32 1.442695, %v1200_v22 }
 0x454   : > { %v2829_v14 = vpop.eup %2828 }
 0x455   : > { %v1318_v15 = vpop.xlane.xlu0 %1317  ;;  %v1084_v16 = vsel %vm916_vm2, %v2829_v14, 0.0 }
 0x456   : > { %v1319_v17 = vsub.f32 %v1311_v63, %v1318_v15  ;;  %1085 = vadd.xlane.f32.xlu0 %v1084_v16 }
 0x458   : > { %v1320_v18 = vmul.f32 1.442695, %v1319_v17 }
 0x45a   : > { %2830 = vpow2.f32 %v1320_v18 }
 0x45b   : > { %2832 = vpow2.f32 %v1201_v23 }
 0x45f   : > { %975 = vrot.lane.b32.xlu1 %v3250_v26, %s2970_s0  ;;  %s3620_s0 = smov 8  }
 0x464   : > { %v2831_v19 = vpop.eup %2830 }
 0x465   : > { %v1322_v20 = vsel %vm916_vm2, %v2831_v19, 0.0  ;;  %v2833_v24 = vpop.eup %2832 }
 0x466   : > { %1323 = vadd.xlane.f32.xlu0 %v1322_v20  ;;  %v1203_v25 = vsel %vm916_vm2, %v2833_v24, 0.0 }
 0x47c   : > { %1090 = vrot.lane.b32.xlu0 %v3250_v26, %s2971_s1  ;;  %s3618_s1 = smov 24  }
 0x483   : > { %1204 = vadd.xlane.f32.xlu1 %v1203_v25 }
 0x494   : > { %1209 = vrot.lane.b32.xlu1 %v3250_v26, %s2972_s7  ;;  %s3657_s7 = sld [smem:[#allocation20_spill]] }
 0x498   : > { %1328 = vrot.lane.b32.xlu1 %v3250_v26, %s2973_s8  ;;  %s3656_s8 = sld [smem:[#allocation19_spill]] }
 0x49e   : > { %v2810_v60 = vld [vmem:[%s3656_s8] sm:$0xff]   ;;  %v2811_v62 = vld [vmem:[%s3656_s8 + $0x8] sm:$0xff]   ;;  %s793_s8 = scalar_lea.vmem %s3658_s30, %s2463_s25  ;;  %s3661_s30 = smov 112  }
 0x49f   : > { %2647 = vmatpush3.bf16.msra.mxu1 %v2810_v60  ;;  %s2526_s25 = sshll.u32 %s3124_s6, 7  ;;  %s2339_s6 = scalar_lea.sflag [#allocation5], %s3208_s5 }
 0x4a0   : > { %2648 = vmatprep.subr.bf16.mxu1 %v2961_v8 }
 0x4a3   : > { %2649 = vmatpush3.bf16.msra.mxu1 %v2811_v62 }
 0x4a4   : > { %2662 = vmatprep.subr.bf16.mxu1 %v2961_v8 }
 0x4db   : > { %v971_v27 = vpop.xlane.xlu1 %970 }
 0x4dc   : > { %2834 = vrcp.f32 %v971_v27 }
 0x4df   : > { %v976_v28 = vpop.permute.xlu1 %975 }
 0x4e0   : > { %v982_v29 = vsel %vm980_vm3, %v976_v28, 0  ;;  %v2812_v28 = vld [vmem:[%s3586_s12] sm:$0xff]  }
 0x4e1   : > { %2605 = vmatpush3.bf16.msra.mxu0 %v982_v29  ;;  %v803_v29 = vld [vmem:[%s793_s8] sm:$0xf]  ;;  %s3663_s8 = sld [smem:[#allocation16_spill]] }
 0x4e2   : > { %2616 = vmatprep.subr.bf16.mxu0 %v2961_v8 }
 0x4e3   : > { %v1086_v31 = vpop.xlane.xlu0 %1085 }
 0x4e4   : > { %2836 = vrcp.f32 %v1086_v31  ;;  %v2815_v31 = vld [vmem:[%s3659_s10 + $0x8] sm:$0xff]  }
 0x4e6   : > { %v2835_v30 = vpop.eup %2834 }
 0x4e7   : > { %v973_v32 = vmul.f32 %v2835_v30, %v2827_v12  ;;  %v2814_v30 = vld [vmem:[%s3659_s10] sm:$0xff]   ;;  %s800_s3 = scalar_lea.vmem %s3663_s8, %s3285_s21  ;;  %s3664_s21 = smov 88  }
 0x4e8   : > { %s3529_s10 = scalar_lea.hbm %s3675_s9, %s2526_s25 }
 0x4e9   : > { %v974_v33 = vpack.c.bf16 %v973_v32, %v973_v32 }
 0x4eb   : > { %2607 = vmatmul.mubr.msk.bf16.vlgmr.msra.gmra.mrb[0].mxu0 %vm916_vm2, %v974_v33 }
 0x4ec   : > { %2618 = vmatprep.mubr.msk.bf16.mxu0 %vm2962_vm1, %v2961_v8 }
 0x4ee   : > { %v2837_v26 = vpop.eup %2836 }
 0x4ef   : > { %v1088_v35 = vmul.f32 %v2837_v26, %v2829_v14  ;;  %v2484_v14 = vld [vmem:[%s3657_s7] ss:$0 sm:$0xff]  ;;  %s3667_s7 = smov 80  }
 0x4f1   : > { %v1089_v38 = vpack.c.bf16 %v1088_v35, %v1088_v35 }
 0x4f3   : > { %v1324_v34 = vpop.xlane.xlu0 %1323 }
 0x4f7   : > { %v1091_v36 = vpop.permute.xlu0 %1090 }
 0x4f8   : > { %v1096_v37 = vsel %vm980_vm3, %v1091_v36, 0 }
 0x4f9   : > { %2617 = vmatpush3.bf16.msra.mxu0 %v1096_v37  ;;  %v2489_v37 = vld [vmem:[%s3591_s17] ss:$0 sm:$0xff] }
 0x4fa   : > { %2628 = vmatprep.subr.bf16.mxu0 %v2961_v8 }
 0x4fc   : > { %2619 = vmatmul.mubr.msk.bf16.vlgmr.msra.gmra.mrb[4].mxu0 %vm916_vm2, %v1089_v38 }
 0x4fd   : > { %2630 = vmatprep.mubr.msk.bf16.mxu0 %vm2962_vm1, %v2961_v8 }
 0x510   : > { %v1205_v39 = vpop.xlane.xlu1 %1204 }
 0x511   : > { %2838 = vrcp.f32 %v1205_v39 }
 0x512   : > { %2840 = vrcp.f32 %v1324_v34  ;;  %v2488_v34 = vld [vmem:[%s3590_s16] ss:$0 sm:$0xff] }
 0x514   : > { %v1210_v40 = vpop.permute.xlu1 %1209 }
 0x515   : > { %v1215_v41 = vsel %vm980_vm3, %v1210_v40, 0 }
 0x516   : > { %2629 = vmatpush3.bf16.msra.mxu0 %v1215_v41  ;;  %v2494_v41 = vld [vmem:[%s3587_s13] ss:$0 sm:$0xff] }
 0x517   : > { %2640 = vmatprep.subr.bf16.mxu0 %v2961_v8 }
 0x518   : > { %v1329_v44 = vpop.permute.xlu1 %1328 }
 0x519   : > { %v1334_v47 = vsel %vm980_vm3, %v1329_v44, 0 }
 0x51b   : > { %v2839_v42 = vpop.eup %2838 }
 0x51c   : > { %v1207_v43 = vmul.f32 %v2839_v42, %v2833_v24  ;;  %v2841_v46 = vpop.eup %2840 }
 0x51d   : > { %v1326_v48 = vmul.f32 %v2841_v46, %v2831_v19 }
 0x51e   : > { %v1208_v45 = vpack.c.bf16 %v1207_v43, %v1207_v43 }
 0x51f   : > { %v1327_v49 = vpack.c.bf16 %v1326_v48, %v1326_v48 }
 0x520   : > { %2631 = vmatmul.mubr.msk.bf16.vlgmr.msra.gmra.mrb[8].mxu0 %vm916_vm2, %v1208_v45 }
 0x521   : > { %2641 = vmatpush3.bf16.msra.mxu0 %v1334_v47  ;;  %2642 = vmatprep.mubr.msk.bf16.mxu0 %vm2962_vm1, %v2961_v8 }
 0x522   : > { %2654 = vmatprep.subr.bf16.mxu0 %v2961_v8 }
 0x528   : > { %2643 = vmatmul.mubr.msk.bf16.vlgmr.msra.gmra.mrb[12].mxu0 %vm916_vm2, %v1327_v49  ;;  %v2490_v49 = vld [vmem:[%s3585_s11] ss:$0 sm:$0xff] }
 0x529   : > { %2658 = vmatprep.mubr.msk.bf16.mxu0 %vm2962_vm1, %v2961_v8  ;;  %2655 = vmatpush3.bf16.msra.mxu0 %v2814_v30 }
 0x52a   : > { %2656 = vmatprep.subr.bf16.mxu0 %v2961_v8 }
 0x52d   : > { %2657 = vmatpush3.bf16.msra.mxu0 %v2815_v31 }
 0x52e   : > { %2670 = vmatprep.subr.bf16.mxu0 %v2961_v8 }
 0x5be   : > { %v1018_v50 = vpop.f32.mrb[0].mxu0 }
 0x5bf   : > { %v1024_v51 = vpack.c.bf16 %v1018_v50, %v1018_v50  ;;  %v2608_v52 = vpop.f32.mrb[1].mxu0 }
 0x5c0   : > { %v1021_v53 = vpop.f32.mrb[2].mxu0 }
 0x5c1   : > { %1026 = vst.msk [vmem:[#allocation2] sm:$0xf] %vm1025_vm4, %v1024_v51  ;;  %v2609_v54 = vpop.f32.mrb[3].mxu0 }
 0x5cf   : > { %v1132_v55 = vpop.f32.mrb[4].mxu0 }
 0x5d0   : > { %v2529_v56 = vpack.c.bf16 %v1132_v55, %v1132_v55  ;;  %v2620_v57 = vpop.f32.mrb[5].mxu0 }
 0x5d1   : > { %v1135_v58 = vpop.f32.mrb[6].mxu0 }
 0x5d2   : > { %1142 = vrot.lane.b32.xlu0 %v2529_v56, %s3620_s0  ;;  %v2621_v59 = vpop.f32.mrb[7].mxu0  ;;  %s3674_s0 = sshll.u32 %s3208_s5, 3 }
 0x5d3   : > { %s789_s8 = scalar_lea.vmem [#allocation6], %s3674_s0 }
 0x5f3   : > { %v1251_v61 = vpop.f32.mrb[8].mxu0 }
 0x5f4   : > { %v2530_v63 = vpack.c.bf16 %v1251_v61, %v1251_v61  ;;  %v2632_v1 = vpop.f32.mrb[9].mxu0 }
 0x5f5   : > { %v1254_v2 = vpop.f32.mrb[10].mxu0 }
 0x5f6   : > { %1261 = vrot.lane.b32.xlu1 %v2530_v63, %s3619_s2  ;;  %v2633_v3 = vpop.f32.mrb[11].mxu0  ;;  %s3662_s2 = smov 104  }
 0x5f7   : > { %v808_v3 = vld [vmem:[%s800_s3] sm:$0x1]  ;;  %s3669_s3 = smov 16  }
 0x5fb   : > { %v1370_v4 = vpop.f32.mrb[12].mxu0 }
 0x5fc   : > { %v2531_v5 = vpack.c.bf16 %v1370_v4, %v1370_v4  ;;  %v2644_v6 = vpop.f32.mrb[13].mxu0  ;;  %v809_v4 = vunpack.c.l.bf16 %v808_v3 }
 0x5fd   : > { %v1373_v7 = vpop.f32.mrb[14].mxu0 }
 0x5fe   : > { %1380 = vrot.lane.b32.xlu0 %v2531_v5, %s3618_s1  ;;  %v2645_v9 = vpop.f32.mrb[15].mxu0  ;;  %v1618_v5 = vlaneseq  ;;  %v2466_v6 = vadd.f32 -1.0, %v809_v4  ;;  %s3666_s1 = smov 72  }
 0x600   : > { %v1619_v7 = vshrl.u32 %v1618_v5, 7  ;;  %v811_v9 = vmul.f32 1e+09, %v2466_v6 }
 0x644   : > { %v1143_v10 = vpop.permute.xlu0 %1142 }
 0x645   : > { %1146 = vst.msk [vmem:[#allocation2] sm:$0xf] %vm1145_vm5, %v1143_v10  ;;  %v1620_v10 = vsub.s32 0, %v1619_v7 }
 0x668   : > { %v1262_v11 = vpop.permute.xlu1 %1261 }
 0x669   : > { %1265 = vst.msk [vmem:[#allocation2] sm:$0xf] %vm1264_vm6, %v1262_v11  ;;  %v1621_v11 = vrot.slane %v811_v9, %v1620_v10 }
 0x670   : > { %v1381_v12 = vpop.permute.xlu0 %1380 }
 0x671   : > { %1384 = vst.msk [vmem:[#allocation2] sm:$0xf] %vm1383_vm7, %v1381_v12 }
 0x678   : > { %v1385_v13 = vld [vmem:[#allocation2] sm:$0xf] }
 0x679   : > { %2651 = vmatmul.mubr.msk.bf16.vlgmr.msra.gmra.mrb[20].mxu1 %vm814_vm0, %v1385_v13 }
 0x67a   : > { %2666 = vmatprep.mubr.msk.bf16.mxu1 %vm2962_vm1, %v2961_v8  ;;  %2663 = vmatpush3.bf16.msra.mxu1 %v2812_v28 }
 0x67b   : > { %2664 = vmatprep.subr.bf16.mxu1 %v2961_v8 }
 0x74c   : > { %v1446_v15 = vpop.f32.mrb[20].mxu1 }
 0x74d   : > { %v1447_v16 = vadd.f32 %v2484_v14, %v1446_v15  ;;  %v2652_v17 = vpop.f32.mrb[21].mxu1 }
 0x74e   : > { %v1449_v18 = vpop.f32.mrb[22].mxu1 }
 0x74f   : > { %v3347_v19 = vadd.f32 %v1447_v16, %v3218_v0  ;;  %v2653_v20 = vpop.f32.mrb[23].mxu1  ;;  %v2813_v0 = vld [vmem:[%s3586_s12 + $0x8] sm:$0xff]  }
 0x750   : > { %2665 = vmatpush3.bf16.msra.mxu1 %v2813_v0 }
 0x751   : > { %v1455_v21 = vsel %vm814_vm0, %v3347_v19, 0.0  ;;  %2676 = vmatprep.subr.bf16.mxu1 %v2961_v8 }
 0x752   : > { %1456 = vadd.xlane.f32.xlu1 %v1455_v21 }
 0x753   : > { %2667 = vmatmul.mubr.msk.bf16.vlgmr.msra.gmra.mrb[24].mxu1 %vm814_vm0, %v803_v29 }
 0x754   : > { %2678 = vmatprep.mubr.msk.bf16.mxu1 %vm2962_vm1, %v2961_v8 }
 0x7df   : > { %v1457_v22 = vpop.xlane.xlu1 %1456 }
 0x7e0   : > { %v1458_v23 = vmul.f32 0.03125, %v1457_v22 }
 0x7e2   : > { %v1459_v24 = vsub.f32 %v3347_v19, %v1458_v23 }
 0x7e4   : > { %v1460_v25 = vmul.f32 %v1459_v24, %v1459_v24  ;;  %v1471_v35 = vmul.f32 %v2488_v34, %v1459_v24 }
 0x7e6   : > { %v1461_v27 = vsel %vm814_vm0, %v1460_v25, 0.0 }
 0x7e7   : > { %1462 = vadd.xlane.f32.xlu0 %v1461_v27 }
 0x826   : > { %v1611_v42 = vpop.f32.mrb[24].mxu1 }
 0x827   : > { %v1612_v43 = vadd.f32 %v2494_v41, %v1611_v42  ;;  %v2668_v44 = vpop.f32.mrb[25].mxu1 }
 0x828   : > { %v1614_v45 = vpop.f32.mrb[26].mxu1 }
 0x829   : > { %v3389_v46 = vpack.c.bf16 %v1612_v43, %v1612_v43  ;;  %v2669_v47 = vpop.f32.mrb[27].mxu1 }
 0x82b   : > { %1734 = vrot.lane.b32.xlu0 %v3389_v46, %s3660_s19  ;;  %v1626_v48 = vsel %vm916_vm2, %v3389_v46, 0 }
 0x874   : > { %v1463_v32 = vpop.xlane.xlu0 %1462 }
 0x875   : > { %v1464_v33 = vmul.f32 0.03125, %v1463_v32 }
 0x877   : > { %v1472_v26 = vadd.f32 1e-06, %v1464_v33 }
 0x879   : > { %2842 = vrsqrt.f32 %v1472_v26 }
 0x883   : > { %v2843_v36 = vpop.eup %2842 }
 0x884   : > { %v1474_v38 = vmul.f32 %v2843_v36, %v1471_v35 }
 0x886   : > { %v1481_v39 = vadd.f32 %v2489_v37, %v1474_v38 }
 0x888   : > { %v1482_v40 = vpack.c.bf16 %v1481_v39, %v1481_v39 }
 0x88a   : > { %2659 = vmatmul.mubr.msk.bf16.vlgmr.msra.gmra.mrb[16].mxu0 %vm814_vm0, %v1482_v40 }
 0x88b   : > { %2672 = vmatprep.mubr.msk.bf16.mxu0 %vm2962_vm1, %v2961_v8  ;;  %2671 = vmatpush3.bf16.xpose.msra.mxu0 %v1626_v48 }
 0x88c   : > { %2682 = vmatprep.subr.bf16.mxu0 %v2961_v8 }
 0x89d   : > { %v1735_v56 = vpop.permute.xlu0 %1734 }
 0x89e   : > { %v1740_v58 = vsel %vm916_vm2, %v1735_v56, 0 }
 0x95d   : > { %v1543_v50 = vpop.f32.mrb[16].mxu0 }
 0x95e   : > { %v1544_v51 = vadd.f32 %v2490_v49, %v1543_v50  ;;  %v2660_v52 = vpop.f32.mrb[17].mxu0 }
 0x95f   : > { %v1546_v53 = vpop.f32.mrb[18].mxu0 }
 0x960   : > { %v1549_v54 = vmul.f32 0.35355338, %v1544_v51  ;;  %v2661_v55 = vpop.f32.mrb[19].mxu0 }
 0x962   : > { %v1550_v57 = vpack.c.bf16 %v1549_v54, %v1549_v54 }
 0x964   : > { %1732 = vrot.lane.b32.xlu1 %v1550_v57, %s3660_s19  ;;  %1850 = vrot.lane.b32.xlu0 %v1550_v57, %s3661_s30  ;;  %s3665_s19 = smov 96  }
 0x965   : > { %2673 = vmatmul.mubr.msk.bf16.vlgmr.msra.gmra.mrb[20].mxu0 %vm916_vm2, %v1550_v57 }
 0x966   : > { %2683 = vmatpush3.bf16.xpose.msra.mxu0 %v1740_v58  ;;  %2684 = vmatprep.mubr.msk.bf16.mxu0 %vm2962_vm1, %v2961_v8 }
 0x967   : > { %2694 = vmatprep.subr.bf16.mxu0 %v2961_v8 }
 0x968   : > { %1852 = vrot.lane.b32.xlu1 %v3389_v46, %s3661_s30  ;;  %1968 = vrot.lane.b32.xlu0 %v1550_v57, %s3662_s2  ;;  %s3668_s30 = smov 8  }
 0x96c   : > { %1970 = vrot.lane.b32.xlu1 %v3389_v46, %s3662_s2  ;;  %s3673_s2 = sld [smem:[#allocation12_spill]] }
 0x972   : > { %p3676_p12 = scmp.ne.s32.totalorder %s3673_s2, 0 }
 0x9d6   : > { %v1733_v59 = vpop.permute.xlu1 %1732  ;;  %v1851_v63 = vpop.permute.xlu0 %1850 }
 0x9d7   : > { %2685 = vmatmul.mubr.msk.bf16.vlgmr.msra.gmra.mrb[24].mxu0 %vm916_vm2, %v1733_v59 }
 0x9d8   : > { %2696 = vmatprep.mubr.msk.bf16.mxu0 %vm2962_vm1, %v2961_v8 }
 0x9da   : > { %v1853_v60 = vpop.permute.xlu1 %1852  ;;  %v1969_v2 = vpop.permute.xlu0 %1968 }
 0x9db   : > { %v1858_v61 = vsel %vm916_vm2, %v1853_v60, 0 }
 0x9dc   : > { %2695 = vmatpush3.bf16.xpose.msra.mxu0 %v1858_v61 }
 0x9dd   : > { %2706 = vmatprep.subr.bf16.mxu0 %v2961_v8 }
 0x9de   : > { %v1971_v62 = vpop.permute.xlu1 %1970 }
 0x9df   : > { %v1976_v1 = vsel %vm916_vm2, %v1971_v62, 0 }
 0x9e3   : > { %2697 = vmatmul.mubr.msk.bf16.vlgmr.msra.gmra.mrb[28].mxu0 %vm916_vm2, %v1851_v63 }
 0x9e4   : > { %2707 = vmatpush3.bf16.xpose.msra.mxu0 %v1976_v1  ;;  %2708 = vmatprep.mubr.msk.bf16.mxu0 %vm2962_vm1, %v2961_v8 }
 0x9e5   : > { %2718 = vmatprep.subr.bf16.mxu0 %v2961_v8 }
 0x9eb   : > { %2709 = vmatmul.mubr.msk.bf16.vlgmr.msra.gmra.mrb[32].mxu0 %vm916_vm2, %v1969_v2 }
 0x9ec   : > { %2722 = vmatprep.mubr.msk.bf16.mxu0 %vm2962_vm1, %v2961_v8 }
 0xa38   : > { %v1662_v12 = vpop.f32.mrb[20].mxu0 }
 0xa39   : > { %v1663_v13 = vadd.f32 %v1662_v12, %v1621_v11  ;;  %v2674_v14 = vpop.f32.mrb[21].mxu0 }
 0xa3a   : > { %v1665_v15 = vpop.f32.mrb[22].mxu0 }
 0xa3b   : > { %v2675_v16 = vpop.f32.mrb[23].mxu0  ;;  %v1668_v17 = vsel %vm916_vm2, %v1663_v13, -inf }
 0xa3c   : > { %1669 = vmax.xlane.f32.xlu1 %v1668_v17 }
 0xaaa   : > { %v1776_v18 = vpop.f32.mrb[24].mxu0 }
 0xaab   : > { %v1777_v20 = vadd.f32 %v1776_v18, %v1621_v11  ;;  %v2686_v21 = vpop.f32.mrb[25].mxu0 }
 0xaac   : > { %v1779_v22 = vpop.f32.mrb[26].mxu0 }
 0xaad   : > { %v2687_v23 = vpop.f32.mrb[27].mxu0  ;;  %v1782_v24 = vsel %vm916_vm2, %v1777_v20, -inf }
 0xaae   : > { %1783 = vmax.xlane.f32.xlu0 %v1782_v24 }
 0xab6   : > { %v1894_v25 = vpop.f32.mrb[28].mxu0 }
 0xab7   : > { %v1895_v27 = vadd.f32 %v1894_v25, %v1621_v11  ;;  %v2698_v28 = vpop.f32.mrb[29].mxu0 }
 0xab8   : > { %v1897_v0 = vpop.f32.mrb[30].mxu0 }
 0xab9   : > { %v2699_v29 = vpop.f32.mrb[31].mxu0  ;;  %v1900_v30 = vsel %vm916_vm2, %v1895_v27, -inf }
 0xaba   : > { %1901 = vmax.xlane.f32.xlu0 %v1900_v30  ;;  %v2816_v29 = vld [vmem:[%s3588_s14] sm:$0xff]  }
 0xabb   : > { %2719 = vmatpush3.bf16.msra.mxu0 %v2816_v29 }
 0xabc   : > { %2720 = vmatprep.subr.bf16.mxu0 %v2961_v8 }
 0xabe   : > { %v2012_v31 = vpop.f32.mrb[32].mxu0 }
 0xabf   : > { %v2013_v32 = vadd.f32 %v2012_v31, %v1621_v11  ;;  %v2710_v33 = vpop.f32.mrb[33].mxu0  ;;  %v2817_v31 = vld [vmem:[%s3588_s14 + $0x8] sm:$0xff]  }
 0xac0   : > { %v2015_v26 = vpop.f32.mrb[34].mxu0  ;;  %2721 = vmatpush3.bf16.msra.mxu0 %v2817_v31 }
 0xac1   : > { %v2711_v34 = vpop.f32.mrb[35].mxu0  ;;  %v2018_v35 = vsel %vm916_vm2, %v2013_v32, -inf  ;;  %2734 = vmatprep.subr.bf16.mxu0 %v2961_v8 }
 0xac2   : > { %2019 = vmax.xlane.f32.xlu1 %v2018_v35 }
 0xac9   : > { %v1670_v36 = vpop.xlane.xlu1 %1669 }
 0xaca   : > { %v1671_v37 = vsub.f32 %v1663_v13, %v1670_v36 }
 0xacc   : > { %v1672_v38 = vmul.f32 1.442695, %v1671_v37 }
 0xace   : > { %2844 = vpow2.f32 %v1672_v38 }
 0xad8   : > { %v2845_v39 = vpop.eup %2844 }
 0xad9   : > { %v1674_v40 = vsel %vm916_vm2, %v2845_v39, 0.0 }
 0xada   : > { %1675 = vadd.xlane.f32.xlu0 %v1674_v40 }
 0xb3b   : > { %v1784_v41 = vpop.xlane.xlu0 %1783 }
 0xb3c   : > { %v1785_v42 = vsub.f32 %v1777_v20, %v1784_v41 }
 0xb3e   : > { %v1786_v43 = vmul.f32 1.442695, %v1785_v42 }
 0xb40   : > { %2846 = vpow2.f32 %v1786_v43 }
 0xb47   : > { %v1902_v44 = vpop.xlane.xlu0 %1901 }
 0xb48   : > { %v1903_v45 = vsub.f32 %v1895_v27, %v1902_v44  ;;  %v2509_v44 = vld [vmem:[%s3589_s15] ss:$0 sm:$0xff] }
 0xb4a   : > { %v2847_v47 = vpop.eup %2846  ;;  %v1904_v48 = vmul.f32 1.442695, %v1903_v45 }
 0xb4b   : > { %v1788_v49 = vsel %vm916_vm2, %v2847_v47, 0.0 }
 0xb4c   : > { %2848 = vpow2.f32 %v1904_v48  ;;  %1789 = vadd.xlane.f32.xlu1 %v1788_v49 }
 0xb4f   : > { %v2020_v52 = vpop.xlane.xlu1 %2019 }
 0xb50   : > { %v2021_v53 = vsub.f32 %v2013_v32, %v2020_v52 }
 0xb52   : > { %v2022_v54 = vmul.f32 1.442695, %v2021_v53 }
 0xb54   : > { %2850 = vpow2.f32 %v2022_v54 }
 0xb56   : > { %v2849_v50 = vpop.eup %2848 }
 0xb57   : > { %v1906_v51 = vsel %vm916_vm2, %v2849_v50, 0.0 }
 0xb58   : > { %1907 = vadd.xlane.f32.xlu0 %v1906_v51 }
 0xb5d   : > { %1794 = vrot.lane.b32.xlu1 %v3389_v46, %s3664_s21  ;;  %s3670_s21 = smov 24  }
 0xb5e   : > { %v2851_v55 = vpop.eup %2850 }
 0xb5f   : > { %v2024_v56 = vsel %vm916_vm2, %v2851_v55, 0.0 }
 0xb67   : > { %v1676_v57 = vpop.xlane.xlu0 %1675 }
 0xb68   : > { %2852 = vrcp.f32 %v1676_v57 }
 0xb6e   : > { %1681 = vrot.lane.b32.xlu0 %v3389_v46, %s3665_s19  ;;  %s3671_s19 = sld [smem:[#allocation24_spill]] }
 0xb72   : > { %2030 = vrot.lane.b32.xlu0 %v3389_v46, %s3666_s1  ;;  %v2853_v59 = vpop.eup %2852 }
 0xb73   : > { %v1678_v61 = vmul.f32 %v2853_v59, %v2845_v39  ;;  %v2820_v59 = vld [vmem:[%s3594_s20] sm:$0xff]  }
 0xb75   : > { %v1679_v2 = vpack.c.bf16 %v1678_v61, %v1678_v61 }
 0xb81   : > { %2025 = vadd.xlane.f32.xlu1 %v2024_v56 }
 0xb92   : > { %1912 = vrot.lane.b32.xlu1 %v3389_v46, %s3667_s7  ;;  %s2977_s7 = smov [#allocation6]  }
 0xbd9   : > { %v1790_v58 = vpop.xlane.xlu1 %1789 }
 0xbda   : > { %2854 = vrcp.f32 %v1790_v58  ;;  %v2818_v58 = vld [vmem:[%s3592_s18] sm:$0xff]  }
 0xbdd   : > { %v1795_v1 = vpop.permute.xlu1 %1794 }
 0xbde   : > { %v1800_v4 = vsel %vm980_vm3, %v1795_v1, 0  ;;  %v2513_v1 = vld [vmem:[%s3596_s22] ss:$0 sm:$0xff] }
 0xbe4   : > { %v2855_v3 = vpop.eup %2854 }
 0xbe5   : > { %v1908_v60 = vpop.xlane.xlu0 %1907  ;;  %v1792_v46 = vmul.f32 %v2855_v3, %v2847_v47 }
 0xbe6   : > { %2856 = vrcp.f32 %v1908_v60  ;;  %v2821_v60 = vld [vmem:[%s3594_s20 + $0x8] sm:$0xff]  }
 0xbe7   : > { %v1793_v5 = vpack.c.bf16 %v1792_v46, %v1792_v46 }
 0xbe9   : > { %v1682_v62 = vpop.permute.xlu0 %1681 }
 0xbea   : > { %v1687_v63 = vsel %vm980_vm3, %v1682_v62, 0 }
 0xbeb   : > { %2677 = vmatpush3.bf16.msra.mxu1 %v1687_v63 }
 0xbec   : > { %2688 = vmatprep.subr.bf16.mxu1 %v2961_v8 }
 0xbed   : > { %v2031_v12 = vpop.permute.xlu0 %2030 }
 0xbee   : > { %2679 = vmatmul.mubr.msk.bf16.vlgmr.msra.gmra.mrb[28].mxu1 %vm916_vm2, %v1679_v2  ;;  %v2036_v14 = vsel %vm980_vm3, %v2031_v12, 0 }
 0xbef   : > { %2689 = vmatpush3.bf16.msra.mxu1 %v1800_v4  ;;  %2690 = vmatprep.mubr.msk.bf16.mxu1 %vm2962_vm1, %v2961_v8  ;;  %v2514_v4 = vld [vmem:[%s3597_s23] ss:$0 sm:$0xff] }
 0xbf0   : > { %2700 = vmatprep.subr.bf16.mxu1 %v2961_v8  ;;  %v2857_v6 = vpop.eup %2856 }
 0xbf1   : > { %v1910_v9 = vmul.f32 %v2857_v6, %v2849_v50 }
 0xbf3   : > { %v1911_v13 = vpack.c.bf16 %v1910_v9, %v1910_v9  ;;  %v2823_v9 = vld [vmem:[%s3594_s20 + $0x18] sm:$0xff]  }
 0xbf6   : > { %2691 = vmatmul.mubr.msk.bf16.vlgmr.msra.gmra.mrb[32].mxu1 %vm916_vm2, %v1793_v5 }
 0xbf7   : > { %2702 = vmatprep.mubr.msk.bf16.mxu1 %vm2962_vm1, %v2961_v8 }
 0xc0e   : > { %v2026_v7 = vpop.xlane.xlu1 %2025 }
 0xc0f   : > { %2858 = vrcp.f32 %v2026_v7  ;;  %v2822_v7 = vld [vmem:[%s3594_s20 + $0x10] sm:$0xff]  }
 0xc12   : > { %v1913_v10 = vpop.permute.xlu1 %1912 }
 0xc13   : > { %v1918_v11 = vsel %vm980_vm3, %v1913_v10, 0  ;;  %v2515_v10 = vld [vmem:[%s3671_s19] ss:$0 sm:$0xff] }
 0xc14   : > { %2701 = vmatpush3.bf16.msra.mxu1 %v1918_v11 }
 0xc15   : > { %2712 = vmatprep.subr.bf16.mxu1 %v2961_v8 }
 0xc17   : > { %2703 = vmatmul.mubr.msk.bf16.vlgmr.msra.gmra.mrb[36].mxu1 %vm916_vm2, %v1911_v13 }
 0xc18   : > { %2713 = vmatpush3.bf16.msra.mxu1 %v2036_v14  ;;  %2714 = vmatprep.mubr.msk.bf16.mxu1 %vm2962_vm1, %v2961_v8 }
 0xc19   : > { %v2859_v15 = vpop.eup %2858  ;;  %2726 = vmatprep.subr.bf16.mxu1 %v2961_v8 }
 0xc1a   : > { %v2028_v16 = vmul.f32 %v2859_v15, %v2851_v55 }
 0xc1c   : > { %v2029_v17 = vpack.c.bf16 %v2028_v16, %v2028_v16 }
 0xc1f   : > { %2715 = vmatmul.mubr.msk.bf16.vlgmr.msra.gmra.mrb[40].mxu1 %vm916_vm2, %v2029_v17 }
 0xc20   : > { %2730 = vmatprep.mubr.msk.bf16.mxu1 %vm2962_vm1, %v2961_v8  ;;  %2727 = vmatpush3.bf16.msra.mxu1 %v2818_v58 }
 0xc21   : > { %2728 = vmatprep.subr.bf16.mxu1 %v2961_v8 }
 0xcc1   : > { %v1723_v18 = vpop.f32.mrb[28].mxu1 }
 0xcc2   : > { %v1729_v20 = vpack.c.bf16 %v1723_v18, %v1723_v18  ;;  %v2680_v21 = vpop.f32.mrb[29].mxu1 }
 0xcc3   : > { %v1726_v22 = vpop.f32.mrb[30].mxu1 }
 0xcc4   : > { %1730 = vst.msk [vmem:[#allocation2] sm:$0xf] %vm1025_vm4, %v1729_v20  ;;  %v2681_v23 = vpop.f32.mrb[31].mxu1 }
 0xcc9   : > { %v1836_v24 = vpop.f32.mrb[32].mxu1 }
 0xcca   : > { %v2532_v25 = vpack.c.bf16 %v1836_v24, %v1836_v24  ;;  %v2692_v27 = vpop.f32.mrb[33].mxu1 }
 0xccb   : > { %v1839_v28 = vpop.f32.mrb[34].mxu1 }
 0xccc   : > { %1846 = vrot.lane.b32.xlu1 %v2532_v25, %s3668_s30  ;;  %v2693_v0 = vpop.f32.mrb[35].mxu1  ;;  %s3672_s30 = sld [smem:[#allocation25_spill]] }
 0xcd2   : > { %v2524_v18 = vld [vmem:[%s3672_s30] ss:$0 sm:$0xff]  ;;  %s2896_s30 = sshll.u32 %s2977_s7, 4  ;;  %s2897_s30 = int_to_ptr.vmem [resolvable:$false] %s2896_s30 }
 0xcd3   : > { %s2898_s0 = scalar_lea.vmem %s2897_s30, 256 }
 0xcea   : > { %v1954_v30 = vpop.f32.mrb[36].mxu1 }
 0xceb   : > { %v2533_v32 = vpack.c.bf16 %v1954_v30, %v1954_v30  ;;  %v2704_v33 = vpop.f32.mrb[37].mxu1 }
 0xcec   : > { %v1957_v26 = vpop.f32.mrb[38].mxu1 }
 0xced   : > { %1964 = vrot.lane.b32.xlu0 %v2533_v32, %s3669_s3  ;;  %v2705_v34 = vpop.f32.mrb[39].mxu1  ;;  %s2352_s3 = sshll.u32 %s789_s8, 4  ;;  %s3531_s3 = int_to_ptr.vmem [resolvable:$true] %s2352_s3 }
 0xcee   : > { %s2892_s1 = scalar_lea.vmem %s3531_s3, 128  ;;  %p2899_p10 = scmp.lt.s32.totalorder %s3531_s3, %s2897_s30 }
 0xcef   : > { %p2893_p11 = scmp.ne.s32.totalorder %s3531_s3, %s2892_s1  ;;  %p2900_p2 = scmp.lt.s32.totalorder %s2898_s0, %s2892_s1 }
 0xcf1   : > { %p2894_p13 = pnand %p2893_p11, %p3676_p12  ;;  %p2901_p4 = por %p2900_p2, %p2899_p10 }
 0xcf2   : > { %v2072_v35 = vpop.f32.mrb[40].mxu1 }
 0xcf3   : > { %v2534_v36 = vpack.c.bf16 %v2072_v35, %v2072_v35  ;;  %v2716_v37 = vpop.f32.mrb[41].mxu1  ;;  %p2895_p7 = pneg %p2894_p13 }
 0xcf4   : > { %v2075_v38 = vpop.f32.mrb[42].mxu1 }
 0xcf5   : > { %2082 = vrot.lane.b32.xlu1 %v2534_v36, %s3670_s21  ;;  %v2717_v39 = vpop.f32.mrb[43].mxu1  ;;  %p2902_p5 = pnand %p2901_p4, %p2895_p7 }
 0xd3e   : > { %v1847_v40 = vpop.permute.xlu1 %1846 }
 0xd3f   : > { %1849 = vst.msk [vmem:[#allocation2] sm:$0xf] %vm1145_vm5, %v1847_v40 }
 0xd5f   : > { %v1965_v41 = vpop.permute.xlu0 %1964 }
 0xd60   : > { %1967 = vst.msk [vmem:[#allocation2] sm:$0xf] %vm1264_vm6, %v1965_v41 }
 0xd67   : > { %v2083_v42 = vpop.permute.xlu1 %2082 }
 0xd68   : > { %2085 = vst.msk [vmem:[#allocation2] sm:$0xf] %vm1383_vm7, %v2083_v42 }
 0xd6f   : > { %v2086_v43 = vld [vmem:[#allocation2] sm:$0xf] }
 0xd70   : > { %2723 = vmatmul.mubr.msk.bf16.vlgmr.msra.gmra.mrb[36].mxu0 %vm814_vm0, %v2086_v43 }
 0xd71   : > { %2742 = vmatprep.mubr.msk.bf16.mxu0 %vm2962_vm1, %v2961_v8  ;;  %2735 = vmatpush3.bf16.msra.mxu0 %v2820_v59 }
 0xd72   : > { %2736 = vmatprep.subr.bf16.mxu0 %v2961_v8 }
 0xd75   : > { %2737 = vmatpush3.bf16.msra.mxu0 %v2821_v60 }
 0xd76   : > { %2738 = vmatprep.subr.bf16.mxu0 %v2961_v8 }
 0xd79   : > { %2739 = vmatpush3.bf16.msra.mxu0 %v2822_v7 }
 0xd7a   : > { %2740 = vmatprep.subr.bf16.mxu0 %v2961_v8 }
 0xd7d   : > { %2741 = vmatpush3.bf16.msra.mxu0 %v2823_v9 }
 0xe43   : > { %v2147_v45 = vpop.f32.mrb[36].mxu0 }
 0xe44   : > { %v2148_v47 = vadd.f32 %v2509_v44, %v2147_v45  ;;  %v2724_v48 = vpop.f32.mrb[37].mxu0 }
 0xe45   : > { %v2150_v49 = vpop.f32.mrb[38].mxu0 }
 0xe46   : > { %v2153_v50 = vadd.f32 %v2148_v47, %v3347_v19  ;;  %v2725_v51 = vpop.f32.mrb[39].mxu0  ;;  %v2819_v19 = vld [vmem:[%s3592_s18 + $0x8] sm:$0xff]  }
 0xe47   : > { %2729 = vmatpush3.bf16.msra.mxu1 %v2819_v19 }
 0xe48   : > { %v2156_v52 = vsel %vm814_vm0, %v2153_v50, 0.0 }
 0xe49   : > { %2157 = vadd.xlane.f32.xlu0 %v2156_v52 }
 0xed6   : > { %v2158_v53 = vpop.xlane.xlu0 %2157 }
 0xed7   : > { %v2159_v54 = vmul.f32 0.03125, %v2158_v53 }
 0xed9   : > { %v2160_v55 = vsub.f32 %v2153_v50, %v2159_v54 }
 0xedb   : > { %v2161_v56 = vmul.f32 %v2160_v55, %v2160_v55  ;;  %v2172_v2 = vmul.f32 %v2513_v1, %v2160_v55 }
 0xedd   : > { %v2162_v57 = vsel %vm814_vm0, %v2161_v56, 0.0 }
 0xede   : > { %2163 = vadd.xlane.f32.xlu1 %v2162_v57 }
 0xf6b   : > { %v2164_v61 = vpop.xlane.xlu1 %2163 }
 0xf6c   : > { %v2165_v62 = vmul.f32 0.03125, %v2164_v61 }
 0xf6e   : > { %v2173_v63 = vadd.f32 1e-06, %v2165_v62 }
 0xf70   : > { %2860 = vrsqrt.f32 %v2173_v63 }
 0xf7a   : > { %v2861_v3 = vpop.eup %2860 }
 0xf7b   : > { %v2175_v46 = vmul.f32 %v2861_v3, %v2172_v2 }
 0xf7d   : > { %v2182_v5 = vadd.f32 %v2514_v4, %v2175_v46 }
 0xf7f   : > { %v2183_v6 = vpack.c.bf16 %v2182_v5, %v2182_v5 }
 0xf81   : > { %2731 = vmatmul.mubr.msk.bf16.vlgmr.msra.gmra.mrb[44].mxu1 %vm814_vm0, %v2183_v6 }
0x1054   : > { %v2244_v11 = vpop.f32.mrb[44].mxu1 }
0x1055   : > { %v2245_v12 = vadd.f32 %v2515_v10, %v2244_v11  ;;  %v2732_v13 = vpop.f32.mrb[45].mxu1 }
0x1056   : > { %v2247_v14 = vpop.f32.mrb[46].mxu1 }
0x1057   : > { %v2250_v15 = vmax.f32 %v2245_v12, 0.0  ;;  %v2733_v16 = vpop.f32.mrb[47].mxu1 }
0x1059   : > { %v2251_v17 = vpack.c.bf16 %v2250_v15, %v2250_v15 }
0x105b   : > { %2743 = vmatmul.mubr.msk.bf16.vlgmr.msra.gmra.mrb[40].mxu0 %vm2284_vm8, %v2251_v17 }
0x112e   : > { %v2322_v8 = vpop.f32.mrb[40].mxu0 }
0x112f   : > { %v2328_v20 = vadd.f32 %v2322_v8, %v2153_v50  ;;  %v2744_v21 = vpop.f32.mrb[41].mxu0 }
0x1130   : > { %v2325_v22 = vpop.f32.mrb[42].mxu0 }
0x1131   : > { %v2336_v23 = vadd.f32 %v2524_v18, %v2328_v20  ;;  %v2745_v24 = vpop.f32.mrb[43].mxu0 }
0x1133   : > { %2337 = vst.msk [vmem:[%s789_s8] sm:$0xff] %vm814_vm0, %v2336_v23 }
0x1134   : > { %2905 = shalt.err (!%p2902_p5)
}
0x1135   : > { %s2906_s5 = scalar_lea.hbm %s3529_s10, 128  ;;  %s2910_s21 = scalar_lea.hbm %s3675_s9, 256 }
0x1136   : > { %p2907_p8 = scmp.ne.s32.totalorder %s3529_s10, %s2906_s5  ;;  %p2911_p1 = scmp.lt.u32.totalorder %s3529_s10, %s3675_s9 }
0x1137   : > { %p2912_p3 = scmp.lt.u32.totalorder %s2910_s21, %s2906_s5  ;;  %p2914_p11 = scmp.lt.u32.totalorder %s2906_s5, %s3529_s10 }
0x1138   : > { %p2908_p9 = pnand %p2907_p8, %p3676_p12 }
0x1139   : > { %p2913_p6 = por %p2912_p3, %p2911_p1 }
0x113a   : > { %p2909_p0 = pneg %p2908_p9 }
0x113b   : > { %p2915_p13 = por %p2914_p11, %p2913_p6 }
0x113d   : > { %p2916_p7 = pnand %p2915_p13, %p2909_p0 }
0x113f   : > { %2919 = shalt.err (!%p2916_p7)
}
0x1140   : > { %2748 = dma.vmem_to_hbm [thread:$0]  (%p3676_p12), %s3531_s3, 128, %s3529_s10, %s2339_s6  }
0x1141 PF: > { %s3677_s1 = sld [smem:[#allocation9_spill]]  ;;  %p3678_p10 = scmp.ne.s32.totalorder %s3645_s4, 0 }
0x1142   : > { %p3679_p2 = scmp.ge.s32.totalorder %s2958_s28, 2 }
0x1144   : > { %p2755_p4 = pnand %p3679_p2, %p3678_p10 }
0x1147   : > { %s2364_s30 = sand.u32 1, %s3677_s1  }
0x1148   : > { %s2365_s0 = scalar_lea.sflag [#allocation5], %s2364_s30 }
0x1149   : > { %2941 = dma.done.wait (!%p2755_p4), %s2365_s0, 128  }
0x114a   : > { %2943 = vsyncadd (!%p2755_p4), %s2365_s0, 4294967168  ;;  %s3680_s28 = sld [smem:[#allocation10_spill]]  ;;  %s3681_s25 = sld [smem:[#allocation11_spill]] }
0x114b   : > { %s3682_s5 = smov %s2950_s26  ;;  %s3683_s26 = smov %s2954_s27 }
0x1150   : > { %p37_p5 = scmp.ge.s32.totalorder %s3680_s28, 4   ;;  %s3684_s27 = smov %s3681_s25 }
0x1152   :  { %39 = sbr.rel (!%p37_p5) target bundleno = 20 (0x14), region = 170 }
0x1159   :  { %2370 = vsyncpa [#allocation4], 1 }
0x115a   :  { %2372 = vsyncpa [#allocation4 + $0x1], 1 }
0x115b   :  { %2373 = vsyncpa [#allocation5], 1 }
0x115c   :  { %2375 = vsyncpa [#allocation5 + $0x1], 1 }

</bundles_post_ra>
